<compile_context>
chip_gen: v7x
topology: tpu7x:2x2x1
jax: 0.10.0
libtpu: 0.0.40
codegen_flags: <defaults>
</compile_context>

<pallas_src>
import functools

import jax
import jax.numpy as jnp
from jax.experimental import pallas as pl
from jax.experimental.pallas import tpu as pltpu


def _point_classifier_kernel(x_ref, w1_ref, sh1_ref, w2_ref, sh2_ref,
                             w3_ref, b3_ref, o_ref):
    """One (batch, point-tile) slab through the full MLP head.

    x_ref  : (1, C_in, tn) f32    input point features (channel-major slab)
    w1_ref : (512, C_in)   bf16   conv1 weight with BN1 scale folded into rows
    sh1_ref: (512, 1)      bf16   folded BN1 shift (includes conv1 bias)
    w2_ref : (256, 512)    bf16   conv2 weight with BN2 scale folded into rows
    sh2_ref: (256, 1)      bf16   folded BN2 shift (includes conv2 bias)
    w3_ref : (WH, 256)     bf16   conv3 weight
    b3_ref : (WH, 1)       f32    conv3 bias
    o_ref  : (1, WH, tn)   bf16   log-softmax over the channel axis (PyTorch dim=1)
    """
    x = x_ref[0].astype(jnp.bfloat16)                                     # (C_in, tn)

    # convs1 (1x1 conv == matmul over channels) + folded BN1 + ReLU (dropout = identity)
    h = jnp.dot(w1_ref[...], x, preferred_element_type=jnp.float32)       # (512, tn) f32
    h = jnp.maximum(h.astype(jnp.bfloat16) + sh1_ref[...], 0.0)           # bf16 epilogue

    # convs2 + folded BN2 + ReLU
    h = jnp.dot(w2_ref[...], h, preferred_element_type=jnp.float32)       # (256, tn) f32
    h = jnp.maximum(h.astype(jnp.bfloat16) + sh2_ref[...], 0.0)           # bf16 epilogue

    # convs3 + bias (keep f32 for the softmax)
    logits = jnp.dot(w3_ref[...], h,
                     preferred_element_type=jnp.float32) + b3_ref[...]    # (WH, tn) f32

    # log_softmax over the channel dim (axis 0 here == PyTorch dim=1), all math in f32
    m = jnp.max(logits, axis=0, keepdims=True)
    z = logits - m
    lse = jnp.log(jnp.sum(jnp.exp(z), axis=0, keepdims=True))
    o_ref[0] = (z - lse).astype(o_ref.dtype)


def _round_up(x, m):
    return ((x + m - 1) // m) * m


def _vmem_estimate(tn, c_in, wh):
    """Rough per-step VMEM bytes: blocks (double-buffered), weights (single), f32 temps."""
    x_blk = 2 * c_in * tn * 4                      # f32 input block x2
    out_blk = 2 * wh * tn * 2                      # bf16 output block x2
    weights = (512 * c_in + 256 * 512 + wh * 256) * 2 + (512 + 256) * 2 + wh * 4
    temps = 3 * wh * tn * 4 + 2 * 512 * tn * 4 + 2 * 512 * tn * 2
    return x_blk + out_blk + weights + temps


def _pick_tn(n, c_in, wh, vmem_budget=40 * 1024 * 1024):
    """Point-tile width: lane axis, multiple of 128 (or == N), minimal last-tile padding,
    capped so the VMEM estimate stays inside the v7x-safe budget."""
    tn_max = 1024 if n >= 2048 else 512
    while True:
        if n <= tn_max:
            tn = n                                  # full extent — always a legal block dim
        else:
            n_tiles = -(-n // tn_max)
            tn = _round_up(-(-n // n_tiles), 128)
        if _vmem_estimate(tn, c_in, wh) <= vmem_budget or tn_max <= 128:
            return tn
        tn_max //= 2


def prepare_params(params, eps=1e-5):
    """One-time fold of BatchNorm (eval mode) + conv biases into weights/shifts, cast to bf16.
       y = gamma*(Wx + b - mean)/sqrt(var+eps) + beta = (scale*W) x + [beta + scale*(b-mean)]"""
    s1 = params["bn1_gamma"] / jnp.sqrt(params["bn1_var"] + eps)
    sh1 = params["bn1_beta"] + s1 * (params["b1"] - params["bn1_mean"])
    s2 = params["bn2_gamma"] / jnp.sqrt(params["bn2_var"] + eps)
    sh2 = params["bn2_beta"] + s2 * (params["b2"] - params["bn2_mean"])
    return {
        "w1": (params["w1"] * s1[:, None]).astype(jnp.bfloat16),   # (512, C_in)
        "sh1": sh1.reshape(-1, 1).astype(jnp.bfloat16),            # (512, 1)
        "w2": (params["w2"] * s2[:, None]).astype(jnp.bfloat16),   # (256, 512)
        "sh2": sh2.reshape(-1, 1).astype(jnp.bfloat16),            # (256, 1)
        "w3": params["w3"].astype(jnp.bfloat16),                   # (WH, 256)
        "b3": params["b3"].reshape(-1, 1).astype(jnp.float32),     # (WH, 1)
    }


@jax.jit
def point_classifier_forward(pc_features, prep):
    """pc_features: (B, C_in, N) f32 -> (B, img_W*img_H, N) bf16 log-probs (dim=1)."""
    B, C_in, N = pc_features.shape
    WH = prep["w3"].shape[0]

    tn = _pick_tn(N, C_in, WH)
    n_tiles = pl.cdiv(N, tn)

    # Grid-invariant operands: constant index map + single-buffered (no double-buffer VMEM).
    def const(arr):
        return pl.BlockSpec(arr.shape, lambda b, j: (0, 0),
                            pipeline_mode=pl.Buffered(1))

    vmem_limit = int(min(48 * 1024 * 1024,
                         max(32 * 1024 * 1024, _vmem_estimate(tn, C_in, WH) * 5 // 4)))

    cost = pl.CostEstimate(
        flops=2 * B * N * (512 * C_in + 256 * 512 + WH * 256),
        transcendentals=B * N * (WH + 1),
        bytes_accessed=(B * C_in * N * 4 + B * WH * N * 2
                        + (512 * C_in + 256 * 512 + WH * 256) * 2
                        + (512 + 256) * 2 + WH * 4),
    )

    return pl.pallas_call(
        _point_classifier_kernel,
        out_shape=jax.ShapeDtypeStruct((B, WH, N), jnp.bfloat16),
        grid_spec=pltpu.PrefetchScalarGridSpec(
            num_scalar_prefetch=0,
            grid=(B, n_tiles),
            in_specs=[
                pl.BlockSpec((1, C_in, tn), lambda b, j: (b, 0, j)),   # x slab (ragged-masked)
                const(prep["w1"]), const(prep["sh1"]),
                const(prep["w2"]), const(prep["sh2"]),
                const(prep["w3"]), const(prep["b3"]),
            ],
            out_specs=pl.BlockSpec((1, WH, tn), lambda b, j: (b, 0, j)),
        ),
        compiler_params=pltpu.CompilerParams(
            dimension_semantics=("parallel", "parallel"),
            vmem_limit_bytes=vmem_limit,
        ),
        cost_estimate=cost,
    )(pc_features, prep["w1"], prep["sh1"], prep["w2"], prep["sh2"],
      prep["w3"], prep["b3"])


def init_params(key, input_channel, img_W, img_H):
    WH = img_W * img_H
    ks = jax.random.split(key, 3)

    def conv_init(k, out_c, in_c):
        # PyTorch Conv1d default: U(-1/sqrt(fan_in), 1/sqrt(fan_in)), fan_in = in_c * kernel(=1)
        bound = 1.0 / jnp.sqrt(jnp.float32(in_c))
        kw, kb = jax.random.split(k)
        w = jax.random.uniform(kw, (out_c, in_c), jnp.float32, -bound, bound)
        b = jax.random.uniform(kb, (out_c,), jnp.float32, -bound, bound)
        return w, b

    w1, b1 = conv_init(ks[0], 512, input_channel)
    w2, b2 = conv_init(ks[1], 256, 512)
    w3, b3 = conv_init(ks[2], WH, 256)
    return {
        "w1": w1, "b1": b1, "w2": w2, "b2": b2, "w3": w3, "b3": b3,
        # BatchNorm1d defaults: gamma=1, beta=0, running_mean=0, running_var=1
        "bn1_gamma": jnp.ones((512,), jnp.float32),
        "bn1_beta": jnp.zeros((512,), jnp.float32),
        "bn1_mean": jnp.zeros((512,), jnp.float32),
        "bn1_var": jnp.ones((512,), jnp.float32),
        "bn2_gamma": jnp.ones((256,), jnp.float32),
        "bn2_beta": jnp.zeros((256,), jnp.float32),
        "bn2_mean": jnp.zeros((256,), jnp.float32),
        "bn2_var": jnp.ones((256,), jnp.float32),
    }


def reference_forward(pc_features, params, eps=1e-5):
    """Pure-JAX f32 reference of the eval-mode PyTorch forward."""
    def bn(h, g, b, m, v):
        return g[:, None] * (h - m[:, None]) / jnp.sqrt(v[:, None] + eps) + b[:, None]

    h = jnp.einsum("oc,bcn->bon", params["w1"], pc_features) + params["b1"][:, None]
    h = jax.nn.relu(bn(h, params["bn1_gamma"], params["bn1_beta"],
                       params["bn1_mean"], params["bn1_var"]))
    h = jnp.einsum("oc,bcn->bon", params["w2"], h) + params["b2"][:, None]
    h = jax.nn.relu(bn(h, params["bn2_gamma"], params["bn2_beta"],
                       params["bn2_mean"], params["bn2_var"]))
    logits = jnp.einsum("oc,bcn->bon", params["w3"], h) + params["b3"][:, None]
    return jax.nn.log_softmax(logits, axis=1)


if __name__ == "__main__":
    key = jax.random.PRNGKey(0)
    B, C_in, N = 2, 16, 64          # small demo: 2 batches, 16 input channels, 64 points
    img_W, img_H = 16, 16           # -> 256 output classes per point

    kp, kx = jax.random.split(key)
    params = init_params(kp, C_in, img_W, img_H)
    pc_features = jax.random.normal(kx, (B, C_in, N), jnp.float32)

    prep = prepare_params(params)   # one-time BN fold + bf16 cast (hoisted out of forward)
    out = point_classifier_forward(pc_features, prep)
    out = jax.block_until_ready(out)

    assert out.shape == (B, img_W * img_H, N)
    out_f32 = out.astype(jnp.float32)

    # sanity 1: log_softmax over dim=1 -> exp sums to ~1 (bf16 output -> loose tolerance)
    sums = jnp.sum(jnp.exp(out_f32), axis=1)
    assert bool(jnp.all(jnp.abs(sums - 1.0) < 3e-2)), "prob-sum check failed"

    # sanity 2: agreement with the pure-JAX f32 reference (bf16 weights/activations/output)
    ref = reference_forward(pc_features, params)
    assert bool(jnp.max(jnp.abs(out_f32 - ref)) < 0.15), "reference mismatch"

    print("KERNEL_OK")
</pallas_src>

<mosaic_0001>
module attributes {stable_mosaic.version = 11 : i64} {
  func.func @_point_classifier_kernel(%arg0: i32, %arg1: i32, %arg2: memref<1x16x64xf32, #tpu.memory_space<vmem>>, %arg3: memref<512x16xbf16, #tpu.memory_space<vmem>>, %arg4: memref<512x1xbf16, #tpu.memory_space<vmem>>, %arg5: memref<256x512xbf16, #tpu.memory_space<vmem>>, %arg6: memref<256x1xbf16, #tpu.memory_space<vmem>>, %arg7: memref<256x256xbf16, #tpu.memory_space<vmem>>, %arg8: memref<256x1xf32, #tpu.memory_space<vmem>>, %arg9: memref<1x256x64xbf16, #tpu.memory_space<vmem>>) attributes {dimension_semantics = [#tpu.dimension_semantics<parallel>, #tpu.dimension_semantics<parallel>], iteration_bounds = array<i64: 2, 1>, scalar_prefetch = 0 : i64, scratch_operands = 0 : i64, tpu.core_type = #tpu.core_type<tc>, window_params = [{transform_indices = @transform_0, window_bounds = array<i64: 1, 16, 64>}, {pipeline_mode = #tpu.pipeline_mode<synchronous>, transform_indices = @transform_1, window_bounds = array<i64: 512, 16>}, {pipeline_mode = #tpu.pipeline_mode<synchronous>, transform_indices = @transform_2, window_bounds = array<i64: 512, 1>}, {pipeline_mode = #tpu.pipeline_mode<synchronous>, transform_indices = @transform_3, window_bounds = array<i64: 256, 512>}, {pipeline_mode = #tpu.pipeline_mode<synchronous>, transform_indices = @transform_4, window_bounds = array<i64: 256, 1>}, {pipeline_mode = #tpu.pipeline_mode<synchronous>, transform_indices = @transform_5, window_bounds = array<i64: 256, 256>}, {pipeline_mode = #tpu.pipeline_mode<synchronous>, transform_indices = @transform_6, window_bounds = array<i64: 256, 1>}, {transform_indices = @transform_7, window_bounds = array<i64: 1, 256, 64>}]} {
    %c0 = arith.constant 0 : index
    %c0_0 = arith.constant 0 : index
    %c0_1 = arith.constant 0 : index
    %0 = vector.load %arg2[%c0, %c0_0, %c0_1] : memref<1x16x64xf32, #tpu.memory_space<vmem>>, vector<1x16x64xf32>
    %1 = vector.shape_cast %0 : vector<1x16x64xf32> to vector<16x64xf32>
    %2 = arith.truncf %1 : vector<16x64xf32> to vector<16x64xbf16>
    %c0_2 = arith.constant 0 : index
    %c0_3 = arith.constant 0 : index
    %3 = vector.load %arg3[%c0_2, %c0_3] : memref<512x16xbf16, #tpu.memory_space<vmem>>, vector<512x16xbf16>
    %cst = arith.constant dense<0.000000e+00> : vector<512x64xf32>
    %4 = tpu.matmul %3, %2, %cst {dimension_numbers = #tpu.dot_dimension_numbers<[1], [0], [0], [1], [0, 0, 1, 1], [], []>} : vector<512x16xbf16>, vector<16x64xbf16>, vector<512x64xf32> -> vector<512x64xf32>
    %5 = arith.truncf %4 : vector<512x64xf32> to vector<512x64xbf16>
    %c0_4 = arith.constant 0 : index
    %c0_5 = arith.constant 0 : index
    %6 = vector.load %arg4[%c0_4, %c0_5] : memref<512x1xbf16, #tpu.memory_space<vmem>>, vector<512x1xbf16>
    %7 = vector.broadcast %6 : vector<512x1xbf16> to vector<512x64xbf16>
    %8 = arith.addf %5, %7 : vector<512x64xbf16>
    %cst_6 = arith.constant 0.000000e+00 : bf16
    %9 = vector.broadcast %cst_6 : bf16 to vector<512x64xbf16>
    %10 = arith.maximumf %8, %9 : vector<512x64xbf16>
    %c0_7 = arith.constant 0 : index
    %c0_8 = arith.constant 0 : index
    %11 = vector.load %arg5[%c0_7, %c0_8] : memref<256x512xbf16, #tpu.memory_space<vmem>>, vector<256x512xbf16>
    %cst_9 = arith.constant dense<0.000000e+00> : vector<256x64xf32>
    %12 = tpu.matmul %11, %10, %cst_9 {dimension_numbers = #tpu.dot_dimension_numbers<[1], [0], [0], [1], [0, 0, 1, 1], [], []>} : vector<256x512xbf16>, vector<512x64xbf16>, vector<256x64xf32> -> vector<256x64xf32>
    %13 = arith.truncf %12 : vector<256x64xf32> to vector<256x64xbf16>
    %c0_10 = arith.constant 0 : index
    %c0_11 = arith.constant 0 : index
    %14 = vector.load %arg6[%c0_10, %c0_11] : memref<256x1xbf16, #tpu.memory_space<vmem>>, vector<256x1xbf16>
    %15 = vector.broadcast %14 : vector<256x1xbf16> to vector<256x64xbf16>
    %16 = arith.addf %13, %15 : vector<256x64xbf16>
    %cst_12 = arith.constant 0.000000e+00 : bf16
    %17 = vector.broadcast %cst_12 : bf16 to vector<256x64xbf16>
    %18 = arith.maximumf %16, %17 : vector<256x64xbf16>
    %c0_13 = arith.constant 0 : index
    %c0_14 = arith.constant 0 : index
    %19 = vector.load %arg7[%c0_13, %c0_14] : memref<256x256xbf16, #tpu.memory_space<vmem>>, vector<256x256xbf16>
    %cst_15 = arith.constant dense<0.000000e+00> : vector<256x64xf32>
    %20 = tpu.matmul %19, %18, %cst_15 {dimension_numbers = #tpu.dot_dimension_numbers<[1], [0], [0], [1], [0, 0, 1, 1], [], []>} : vector<256x256xbf16>, vector<256x64xbf16>, vector<256x64xf32> -> vector<256x64xf32>
    %c0_16 = arith.constant 0 : index
    %c0_17 = arith.constant 0 : index
    %21 = vector.load %arg8[%c0_16, %c0_17] : memref<256x1xf32, #tpu.memory_space<vmem>>, vector<256x1xf32>
    %22 = vector.broadcast %21 : vector<256x1xf32> to vector<256x64xf32>
    %23 = arith.addf %20, %22 : vector<256x64xf32>
    %cst_18 = arith.constant dense<0xFF800000> : vector<64xf32>
    %24 = vector.multi_reduction <maximumf>, %23, %cst_18 [0] : vector<256x64xf32> to vector<64xf32>
    %25 = vector.shape_cast %24 : vector<64xf32> to vector<1x64xf32>
    %26 = vector.broadcast %25 : vector<1x64xf32> to vector<256x64xf32>
    %27 = arith.subf %23, %26 : vector<256x64xf32>
    %28 = math.exp %27 : vector<256x64xf32>
    %cst_19 = arith.constant dense<0.000000e+00> : vector<64xf32>
    %29 = vector.multi_reduction <add>, %28, %cst_19 [0] : vector<256x64xf32> to vector<64xf32>
    %30 = vector.shape_cast %29 : vector<64xf32> to vector<1x64xf32>
    %31 = math.log %30 : vector<1x64xf32>
    %32 = vector.broadcast %31 : vector<1x64xf32> to vector<256x64xf32>
    %33 = arith.subf %27, %32 : vector<256x64xf32>
    %34 = arith.truncf %33 : vector<256x64xf32> to vector<256x64xbf16>
    %c0_20 = arith.constant 0 : index
    %c0_21 = arith.constant 0 : index
    %c0_22 = arith.constant 0 : index
    %35 = vector.load %arg9[%c0_20, %c0_21, %c0_22] : memref<1x256x64xbf16, #tpu.memory_space<vmem>>, vector<1x256x64xbf16>
    %36 = vector.shape_cast %35 : vector<1x256x64xbf16> to vector<256x64xbf16>
    %37 = vector.shape_cast %34 : vector<256x64xbf16> to vector<1x256x64xbf16>
    tpu.vector_store %arg9[%c0_20, %c0_21, %c0_22], %37 {strides = array<i32>} : memref<1x256x64xbf16, #tpu.memory_space<vmem>>, vector<1x256x64xbf16>,
    return
  }
  func.func @transform_0(%arg0: i32, %arg1: i32) -> (i32, i32, i32) {
    %c0_i32 = arith.constant 0 : i32
    %c0_i32_0 = arith.constant 0 : i32
    return %arg0, %c0_i32, %arg1 : i32, i32, i32
  }
  func.func @transform_1(%arg0: i32, %arg1: i32) -> (i32, i32) {
    %c0_i32 = arith.constant 0 : i32
    %c0_i32_0 = arith.constant 0 : i32
    %c0_i32_1 = arith.constant 0 : i32
    return %c0_i32, %c0_i32_0 : i32, i32
  }
  func.func @transform_2(%arg0: i32, %arg1: i32) -> (i32, i32) {
    %c0_i32 = arith.constant 0 : i32
    %c0_i32_0 = arith.constant 0 : i32
    %c0_i32_1 = arith.constant 0 : i32
    return %c0_i32, %c0_i32_0 : i32, i32
  }
  func.func @transform_3(%arg0: i32, %arg1: i32) -> (i32, i32) {
    %c0_i32 = arith.constant 0 : i32
    %c0_i32_0 = arith.constant 0 : i32
    %c0_i32_1 = arith.constant 0 : i32
    return %c0_i32, %c0_i32_0 : i32, i32
  }
  func.func @transform_4(%arg0: i32, %arg1: i32) -> (i32, i32) {
    %c0_i32 = arith.constant 0 : i32
    %c0_i32_0 = arith.constant 0 : i32
    %c0_i32_1 = arith.constant 0 : i32
    return %c0_i32, %c0_i32_0 : i32, i32
  }
  func.func @transform_5(%arg0: i32, %arg1: i32) -> (i32, i32) {
    %c0_i32 = arith.constant 0 : i32
    %c0_i32_0 = arith.constant 0 : i32
    %c0_i32_1 = arith.constant 0 : i32
    return %c0_i32, %c0_i32_0 : i32, i32
  }
  func.func @transform_6(%arg0: i32, %arg1: i32) -> (i32, i32) {
    %c0_i32 = arith.constant 0 : i32
    %c0_i32_0 = arith.constant 0 : i32
    %c0_i32_1 = arith.constant 0 : i32
    return %c0_i32, %c0_i32_0 : i32, i32
  }
  func.func @transform_7(%arg0: i32, %arg1: i32) -> (i32, i32, i32) {
    %c0_i32 = arith.constant 0 : i32
    %c0_i32_0 = arith.constant 0 : i32
    return %arg0, %c0_i32, %arg1 : i32, i32, i32
  }
}

</mosaic_0001>

<bundles_post_ra>
// kernel: point_classifier_forward.1
= control target key start
LH: loop header
LB: loop body
LE: loop exit
PB: predicated region body
PF: predicated region fallthrough
CT: control target
= control target key end

     0   :  { %s5440_s24 = smov 0   ;;  %s5442_s25 = smov 0   ;;  %s7335_s0 = inlined_call_operand.vmem [shape: f32[2,16,64], index: 0, kind: input, shape index: {}]   ;;  %s7336_s1 = inlined_call_operand.vmem [shape: bf16[512,16], index: 1, kind: input, shape index: {}]   ;;  %s7337_s2 = inlined_call_operand.vmem [shape: bf16[512,1], index: 2, kind: input, shape index: {}]   ;;  %s7338_s3 = inlined_call_operand.vmem [shape: bf16[256,512], index: 3, kind: input, shape index: {}]   ;;  %s7339_s4 = inlined_call_operand.vmem [shape: bf16[256,1], index: 4, kind: input, shape index: {}]   ;;  %s7340_s5 = inlined_call_operand.vmem [shape: bf16[256,256], index: 5, kind: input, shape index: {}]   ;;  %s7341_s6 = inlined_call_operand.vmem [shape: f32[256,1], index: 6, kind: input, shape index: {}]   ;;  %s7342_s7 = inlined_call_operand.vmem [shape: bf16[2,256,64], index: 7, kind: output, shape index: {}]  }
   0x1   :  { %s5444_s26 = smov 0  }
   0x2 LB: > { %s29_s27 = sadd.s32 1, %s5392_s25  ;;  %p4372_p0 = scmp.ge.s32.totalorder %s5396_s26, 1  ;;  %s5396_s26 = sphi %s5444_s26, %s17_s26   ;;  %s5392_s25 = sphi %s5442_s25, %s7406_s25   ;;  %s5388_s24 = sphi %s5440_s24, %s7405_s24  }
   0x3   : > { %p31_p1 = scmp.ge.s32.totalorder %s29_s27, 2  ;;  %p256_p2 = scmp.lt.s32.totalorder %s5396_s26, 3 }
   0x5   : > { %s7408_s27 = smov (%p31_p1, %s29_s27), 0  ;;  %p257_p3 = pnand %p4372_p0, %p256_p2 }
   0x7   : > { %260 = sbr.rel (%p257_p3) target bundleno = 1211 (0x4bb), region = 48 }
   0xe   : > { %v1004_v0 = vld [vmem:[%s7337_s2 + $0xc0] sm:$0xf]  ;;  %p294_p4 = scmp.lt.s32.totalorder %s5388_s24, 1  ;;  %v7343_v2 = vmov 0   ;;  %v1005_v3 = vld [vmem:[%s7337_s2 + $0xc4] sm:$0xf] }
   0xf   : > { %v972_v1 = vld [vmem:[%s7337_s2 + $0x40] sm:$0xf]  ;;  %5131 = vset.pattern.permute.xlu1 %v7343_v2  ;;  %5130 = vset.pattern.permute.xlu0 %v7343_v2  ;;  %v973_v4 = vld [vmem:[%s7337_s2 + $0x44] sm:$0xf]  ;;  %vm538_vm0 = vcmask 130048   ;;  %v5133_v11 = vld [vmem:[%s7336_s1 + $0x8] sm:$0xff]  }
  0x10   : > { %1598 = vperm.xlu1 %5131, %v1004_v0   ;;  %1214 = vperm.xlu0 %5130, %v972_v1   ;;  %s7410_s24 = smov (!%p294_p4, %s5388_s24), 1  ;;  %v5132_v5 = vld [vmem:[%s7336_s1] sm:$0xff]   ;;  %v5134_v13 = vld [vmem:[%s7336_s1 + $0x10] sm:$0xff]   ;;  %v975_v15 = vld [vmem:[%s7337_s2 + $0x4c] sm:$0xf]  ;;  %vm3855_vm1 = vcmask 523264  }
  0x11   : > { %s4619_s15 = sshll.u32 %s7410_s24, 4  ;;  %5024 = vmatprep.mubr.msk.bf16.mxu0 %vm538_vm0, %v5132_v5  ;;  %v957_v6 = vld [vmem:[%s7337_s2 + $0x4] sm:$0xf]  ;;  %v956_v10 = vld [vmem:[%s7337_s2] sm:$0xf]  ;;  %v5135_v17 = vld [vmem:[%s7336_s1 + $0x18] sm:$0xff]  }
  0x12   : > { %s301_s18 = scalar_lea.vmem %s7335_s0, %s4619_s15  ;;  %v989_v12 = vld [vmem:[%s7337_s2 + $0x84] sm:$0xf]  ;;  %v988_v14 = vld [vmem:[%s7337_s2 + $0x80] sm:$0xf]  ;;  %v974_v16 = vld [vmem:[%s7337_s2 + $0x48] sm:$0xf] }
  0x13   : > { %v311_v7 = vld [vmem:[%s301_s18] sm:$0xff]  ;;  %v312_v8 = vld [vmem:[%s301_s18 + $0x8] sm:$0xff]  ;;  %v5138_v25 = vld [vmem:[%s7336_s1 + $0x30] sm:$0xff]   ;;  %vm4252_vm2 = vcmask 519168   ;;  %s4620_s8 = sshll.u32 %s7410_s24, 7 }
  0x14   : > { %1610 = vperm.xlu1 %5131, %v1005_v3   ;;  %1226 = vperm.xlu0 %5130, %v973_v4   ;;  %v313_v9 = vpack.c.bf16 %v312_v8, %v311_v7  ;;  %v1007_v18 = vld [vmem:[%s7337_s2 + $0xcc] sm:$0xf]  ;;  %v5136_v19 = vld [vmem:[%s7336_s1 + $0x20] sm:$0xff]   ;;  %v1006_v20 = vld [vmem:[%s7337_s2 + $0xc8] sm:$0xf]  ;;  %s7224_s10 = scalar_lea.vmem %s7342_s7, %s4620_s8 }
  0x15   : > { %v959_v21 = vld [vmem:[%s7337_s2 + $0xc] sm:$0xf]  ;;  %v958_v22 = vld [vmem:[%s7337_s2 + $0x8] sm:$0xf]  ;;  %v977_v27 = vld [vmem:[%s7337_s2 + $0x54] sm:$0xf] }
  0x16   : > { %5022 = vmatprep.subr.bf16.mxu0 %v313_v9  ;;  %v5137_v23 = vld [vmem:[%s7336_s1 + $0x28] sm:$0xff]   ;;  %v976_v28 = vld [vmem:[%s7337_s2 + $0x50] sm:$0xf]  ;;  %v5139_v29 = vld [vmem:[%s7336_s1 + $0x38] sm:$0xff]  }
  0x17   : > { %5023 = vmatpush3.bf16.msra.mxu0 %v313_v9  ;;  %v991_v24 = vld [vmem:[%s7337_s2 + $0x8c] sm:$0xf]  ;;  %v990_v26 = vld [vmem:[%s7337_s2 + $0x88] sm:$0xf]  ;;  %v1009_v30 = vld [vmem:[%s7337_s2 + $0xd4] sm:$0xf] }
  0x18   : > { %1034 = vperm.xlu1 %5131, %v957_v6   ;;  %1022 = vperm.xlu0 %5130, %v956_v10   ;;  %v5140_v31 = vld [vmem:[%s7336_s1 + $0x40] sm:$0xff]   ;;  %v1008_v32 = vld [vmem:[%s7337_s2 + $0xd0] sm:$0xf]  ;;  %v961_v33 = vld [vmem:[%s7337_s2 + $0x14] sm:$0xf] }
  0x19   : > { %v960_v34 = vld [vmem:[%s7337_s2 + $0x10] sm:$0xf]  ;;  %v5141_v35 = vld [vmem:[%s7336_s1 + $0x48] sm:$0xff]   ;;  %v993_v36 = vld [vmem:[%s7337_s2 + $0x94] sm:$0xf] }
  0x1a   : > { %5025 = vmatmul.mubr.msk.bf16.vlgmr.msra.gmra.mrb[0].mxu0 %vm538_vm0, %v5133_v11  ;;  %v5142_v37 = vld [vmem:[%s7336_s1 + $0x50] sm:$0xff]   ;;  %v979_v39 = vld [vmem:[%s7337_s2 + $0x5c] sm:$0xf]  ;;  %v978_v40 = vld [vmem:[%s7337_s2 + $0x58] sm:$0xf] }
  0x1b   : > { %5028 = vmatprep.mubr.msk.bf16.mxu0 %vm538_vm0, %v5134_v13  ;;  %v992_v38 = vld [vmem:[%s7337_s2 + $0x90] sm:$0xf]  ;;  %v5143_v41 = vld [vmem:[%s7336_s1 + $0x58] sm:$0xff]   ;;  %v5144_v43 = vld [vmem:[%s7336_s1 + $0x60] sm:$0xff]  }
  0x1c   : > { %1418 = vperm.xlu1 %5131, %v989_v12   ;;  %1406 = vperm.xlu0 %5130, %v988_v14   ;;  %v1011_v42 = vld [vmem:[%s7337_s2 + $0xdc] sm:$0xf]  ;;  %v1010_v44 = vld [vmem:[%s7337_s2 + $0xd8] sm:$0xf]  ;;  %v5145_v47 = vld [vmem:[%s7336_s1 + $0x68] sm:$0xff]  }
  0x1d   : > { %v963_v45 = vld [vmem:[%s7337_s2 + $0x1c] sm:$0xf]  ;;  %v962_v46 = vld [vmem:[%s7337_s2 + $0x18] sm:$0xf]  ;;  %v5146_v49 = vld [vmem:[%s7336_s1 + $0x70] sm:$0xff]  }
  0x1e   : > { %v995_v48 = vld [vmem:[%s7337_s2 + $0x9c] sm:$0xf]  ;;  %v994_v50 = vld [vmem:[%s7337_s2 + $0x98] sm:$0xf]  ;;  %v981_v51 = vld [vmem:[%s7337_s2 + $0x64] sm:$0xf] }
  0x1f   : > { %v980_v52 = vld [vmem:[%s7337_s2 + $0x60] sm:$0xf]  ;;  %v5147_v53 = vld [vmem:[%s7336_s1 + $0x78] sm:$0xff]   ;;  %v1013_v54 = vld [vmem:[%s7337_s2 + $0xe4] sm:$0xf] }
  0x20   : > { %1250 = vperm.xlu1 %5131, %v975_v15   ;;  %1238 = vperm.xlu0 %5130, %v974_v16   ;;  %v1012_v55 = vld [vmem:[%s7337_s2 + $0xe0] sm:$0xf]  ;;  %v965_v57 = vld [vmem:[%s7337_s2 + $0x24] sm:$0xf]  ;;  %v5149_v59 = vld [vmem:[%s7336_s1 + $0x88] sm:$0xff]  }
  0x21   : > { %v5148_v56 = vld [vmem:[%s7336_s1 + $0x80] sm:$0xff]   ;;  %v5150_v62 = vld [vmem:[%s7336_s1 + $0x90] sm:$0xff]   ;;  %v983_v63 = vld [vmem:[%s7337_s2 + $0x6c] sm:$0xf] }
  0x22   : > { %5029 = vmatmul.mubr.msk.bf16.gmra.mrb[4].mxu0 %vm538_vm0, %v5135_v17  ;;  %v964_v58 = vld [vmem:[%s7337_s2 + $0x20] sm:$0xf]  ;;  %v997_v60 = vld [vmem:[%s7337_s2 + $0xa4] sm:$0xf]  ;;  %v982_v0 = vld [vmem:[%s7337_s2 + $0x68] sm:$0xf] }
  0x23   : > { %5032 = vmatprep.mubr.msk.bf16.mxu0 %vm538_vm0, %v5136_v19  ;;  %v996_v61 = vld [vmem:[%s7337_s2 + $0xa0] sm:$0xf]  ;;  %v5151_v1 = vld [vmem:[%s7336_s1 + $0x98] sm:$0xff]   ;;  %v1015_v3 = vld [vmem:[%s7337_s2 + $0xec] sm:$0xf] }
  0x24   : > { %1634 = vperm.xlu1 %5131, %v1007_v18   ;;  %1622 = vperm.xlu0 %5130, %v1006_v20   ;;  %v1014_v4 = vld [vmem:[%s7337_s2 + $0xe8] sm:$0xf]  ;;  %v5152_v5 = vld [vmem:[%s7336_s1 + $0xa0] sm:$0xff]   ;;  %v967_v6 = vld [vmem:[%s7337_s2 + $0x2c] sm:$0xf] }
  0x25   : > { %v966_v7 = vld [vmem:[%s7337_s2 + $0x28] sm:$0xf]  ;;  %v999_v9 = vld [vmem:[%s7337_s2 + $0xac] sm:$0xf]  ;;  %v5154_v11 = vld [vmem:[%s7336_s1 + $0xb0] sm:$0xff]  }
  0x26   : > { %v5153_v8 = vld [vmem:[%s7336_s1 + $0xa8] sm:$0xff]   ;;  %v985_v12 = vld [vmem:[%s7337_s2 + $0x74] sm:$0xf]  ;;  %v984_v13 = vld [vmem:[%s7337_s2 + $0x70] sm:$0xf] }
  0x27   : > { %v998_v10 = vld [vmem:[%s7337_s2 + $0xa8] sm:$0xf]  ;;  %v5155_v14 = vld [vmem:[%s7336_s1 + $0xb8] sm:$0xff]   ;;  %v1017_v15 = vld [vmem:[%s7337_s2 + $0xf4] sm:$0xf] }
  0x28   : > { %1058 = vperm.xlu1 %5131, %v959_v21   ;;  %1046 = vperm.xlu0 %5130, %v958_v22   ;;  %v1016_v16 = vld [vmem:[%s7337_s2 + $0xf0] sm:$0xf]  ;;  %v5156_v17 = vld [vmem:[%s7336_s1 + $0xc0] sm:$0xff]   ;;  %v969_v18 = vld [vmem:[%s7337_s2 + $0x34] sm:$0xf] }
  0x29   : > { %v968_v19 = vld [vmem:[%s7337_s2 + $0x30] sm:$0xf]  ;;  %v5157_v20 = vld [vmem:[%s7336_s1 + $0xc8] sm:$0xff]   ;;  %v1001_v21 = vld [vmem:[%s7337_s2 + $0xb4] sm:$0xf] }
  0x2a   : > { %5033 = vmatmul.mubr.msk.bf16.gmra.mrb[8].mxu0 %vm538_vm0, %v5137_v23  ;;  %v5158_v22 = vld [vmem:[%s7336_s1 + $0xd0] sm:$0xff]  }
  0x2b   : > { %5036 = vmatprep.mubr.msk.bf16.mxu0 %vm538_vm0, %v5138_v25  ;;  %v1000_v23 = vld [vmem:[%s7337_s2 + $0xb0] sm:$0xf]  ;;  %v986_v25 = vld [vmem:[%s7337_s2 + $0x78] sm:$0xf] }
  0x2c   : > { %1442 = vperm.xlu1 %5131, %v991_v24   ;;  %1430 = vperm.xlu0 %5130, %v990_v26   ;;  %v987_v24 = vld [vmem:[%s7337_s2 + $0x7c] sm:$0xf] }
  0x2d   : > { %v5159_v26 = vld [vmem:[%s7336_s1 + $0xd8] sm:$0xff]  }
  0x30   : > { %1274 = vperm.xlu1 %5131, %v977_v27   ;;  %1262 = vperm.xlu0 %5130, %v976_v28   ;;  %v1019_v27 = vld [vmem:[%s7337_s2 + $0xfc] sm:$0xf]  ;;  %v5160_v28 = vld [vmem:[%s7336_s1 + $0xe0] sm:$0xff]  }
  0x32   : > { %5037 = vmatmul.mubr.msk.bf16.gmra.mrb[12].mxu0 %vm538_vm0, %v5139_v29  ;;  %v1018_v29 = vld [vmem:[%s7337_s2 + $0xf8] sm:$0xf] }
  0x33   : > { %5040 = vmatprep.mubr.msk.bf16.mxu0 %vm538_vm0, %v5140_v31  ;;  %v970_v31 = vld [vmem:[%s7337_s2 + $0x38] sm:$0xf] }
  0x34   : > { %1658 = vperm.xlu1 %5131, %v1009_v30   ;;  %1646 = vperm.xlu0 %5130, %v1008_v32   ;;  %v971_v30 = vld [vmem:[%s7337_s2 + $0x3c] sm:$0xf]  ;;  %v5161_v32 = vld [vmem:[%s7336_s1 + $0xe8] sm:$0xff]  }
  0x38   : > { %1082 = vperm.xlu1 %5131, %v961_v33   ;;  %1070 = vperm.xlu0 %5130, %v960_v34   ;;  %v1003_v33 = vld [vmem:[%s7337_s2 + $0xbc] sm:$0xf]  ;;  %v5162_v34 = vld [vmem:[%s7336_s1 + $0xf0] sm:$0xff]  }
  0x3a   : > { %5041 = vmatmul.mubr.msk.bf16.gmra.mrb[16].mxu0 %vm538_vm0, %v5141_v35  ;;  %v1002_v35 = vld [vmem:[%s7337_s2 + $0xb8] sm:$0xf] }
  0x3b   : > { %5044 = vmatprep.mubr.msk.bf16.mxu0 %vm538_vm0, %v5142_v37  ;;  %v2782_v37 = vld [vmem:[%s7339_s4 + $0x40] sm:$0xf] }
  0x3c   : > { %1466 = vperm.xlu1 %5131, %v993_v36   ;;  %1454 = vperm.xlu0 %5130, %v992_v38   ;;  %v2783_v36 = vld [vmem:[%s7339_s4 + $0x44] sm:$0xf] }
  0x40   : > { %1298 = vperm.xlu1 %5131, %v979_v39   ;;  %1286 = vperm.xlu0 %5130, %v978_v40   ;;  %v5163_v40 = vld [vmem:[%s7336_s1 + $0xf8] sm:$0xff]  }
  0x42   : > { %5045 = vmatmul.mubr.msk.bf16.gmra.mrb[20].mxu0 %vm538_vm0, %v5143_v41  ;;  %v2767_v41 = vld [vmem:[%s7339_s4 + $0x4] sm:$0xf] }
  0x43   : > { %5048 = vmatprep.mubr.msk.bf16.mxu0 %vm538_vm0, %v5144_v43 }
  0x44   : > { %1682 = vperm.xlu1 %5131, %v1011_v42   ;;  %1670 = vperm.xlu0 %5130, %v1010_v44   ;;  %v2766_v42 = vld [vmem:[%s7339_s4] sm:$0xf] }
  0x48   : > { %1106 = vperm.xlu1 %5131, %v963_v45   ;;  %1094 = vperm.xlu0 %5130, %v962_v46   ;;  %v2785_v45 = vld [vmem:[%s7339_s4 + $0x4c] sm:$0xf]  ;;  %v2784_v46 = vld [vmem:[%s7339_s4 + $0x48] sm:$0xf] }
  0x4a   : > { %5049 = vmatmul.mubr.msk.bf16.gmra.mrb[24].mxu0 %vm538_vm0, %v5145_v47 }
  0x4b   : > { %5052 = vmatprep.mubr.msk.bf16.mxu0 %vm538_vm0, %v5146_v49  ;;  %v2769_v49 = vld [vmem:[%s7339_s4 + $0xc] sm:$0xf] }
  0x4c   : > { %1490 = vperm.xlu1 %5131, %v995_v48   ;;  %1478 = vperm.xlu0 %5130, %v994_v50   ;;  %v2768_v50 = vld [vmem:[%s7339_s4 + $0x8] sm:$0xf] }
  0x50   : > { %1322 = vperm.xlu1 %5131, %v981_v51   ;;  %1310 = vperm.xlu0 %5130, %v980_v52  }
  0x52   : > { %5053 = vmatmul.mubr.msk.bf16.gmra.mrb[28].mxu0 %vm538_vm0, %v5147_v53  ;;  %v2787_v53 = vld [vmem:[%s7339_s4 + $0x54] sm:$0xf] }
  0x53   : > { %5056 = vmatprep.mubr.msk.bf16.mxu0 %vm538_vm0, %v5148_v56 }
  0x54   : > { %1706 = vperm.xlu1 %5131, %v1013_v54   ;;  %1694 = vperm.xlu0 %5130, %v1012_v55   ;;  %v2786_v54 = vld [vmem:[%s7339_s4 + $0x50] sm:$0xf] }
  0x58   : > { %1130 = vperm.xlu1 %5131, %v965_v57   ;;  %1118 = vperm.xlu0 %5130, %v964_v58   ;;  %v2771_v57 = vld [vmem:[%s7339_s4 + $0x14] sm:$0xf]  ;;  %v2770_v58 = vld [vmem:[%s7339_s4 + $0x10] sm:$0xf] }
  0x5a   : > { %5057 = vmatmul.mubr.msk.bf16.gmra.mrb[32].mxu0 %vm538_vm0, %v5149_v59 }
  0x5b   : > { %5060 = vmatprep.mubr.msk.bf16.mxu0 %vm538_vm0, %v5150_v62  ;;  %v5399_v62 = vmov 839922192  }
  0x5c   : > { %1514 = vperm.xlu1 %5131, %v997_v60   ;;  %1502 = vperm.xlu0 %5130, %v996_v61   ;;  %v2789_v61 = vld [vmem:[%s7339_s4 + $0x5c] sm:$0xf] }
  0x60   : > { %1346 = vperm.xlu1 %5131, %v983_v63   ;;  %1334 = vperm.xlu0 %5130, %v982_v0   ;;  %v1026_v63 = vunpack.c.l.s4 %v5399_v62  ;;  %v1028_v0 = vlaneseq  ;;  %v3342_v62 = vld [vmem:[%s7341_s6] sm:$0xff] }
  0x62   : > { %5061 = vmatmul.mubr.msk.bf16.gmra.mrb[36].mxu0 %vm538_vm0, %v5151_v1  ;;  %v2788_v1 = vld [vmem:[%s7339_s4 + $0x58] sm:$0xf] }
  0x63   : > { %5064 = vmatprep.mubr.msk.bf16.mxu0 %vm538_vm0, %v5152_v5  ;;  %v2773_v5 = vld [vmem:[%s7339_s4 + $0x1c] sm:$0xf] }
  0x64   : > { %1730 = vperm.xlu1 %5131, %v1015_v3   ;;  %1718 = vperm.xlu0 %5130, %v1014_v4  }
  0x68   : > { %1154 = vperm.xlu1 %5131, %v967_v6   ;;  %1142 = vperm.xlu0 %5130, %v966_v7   ;;  %v1027_v6 = vunpack.c.0.s8 %v1026_v63  ;;  %v1029_v7 = vshrl.u32 %v1028_v0, 7 }
  0x6a   : > { %5065 = vmatmul.mubr.msk.bf16.gmra.mrb[40].mxu0 %vm538_vm0, %v5153_v8  ;;  %v2772_v8 = vld [vmem:[%s7339_s4 + $0x18] sm:$0xf] }
  0x6b   : > { %5068 = vmatprep.mubr.msk.bf16.mxu0 %vm538_vm0, %v5154_v11  ;;  %v2791_v11 = vld [vmem:[%s7339_s4 + $0x64] sm:$0xf] }
  0x6c   : > { %1538 = vperm.xlu1 %5131, %v999_v9   ;;  %1526 = vperm.xlu0 %5130, %v998_v10  }
  0x70   : > { %1370 = vperm.xlu1 %5131, %v985_v12   ;;  %1358 = vperm.xlu0 %5130, %v984_v13   ;;  %v5869_v12 = vsub.s32 %v1027_v6, %v1029_v7  ;;  %v2790_v13 = vld [vmem:[%s7339_s4 + $0x60] sm:$0xf]  ;;  %v3344_v6 = vld [vmem:[%s7341_s6 + $0x10] sm:$0xff] }
  0x72   : > { %5069 = vmatmul.mubr.msk.bf16.gmra.mrb[44].mxu0 %vm538_vm0, %v5155_v14 }
  0x73   : > { %5072 = vmatprep.mubr.msk.bf16.mxu0 %vm538_vm0, %v5156_v17 }
  0x74   : > { %1754 = vperm.xlu1 %5131, %v1017_v15   ;;  %1742 = vperm.xlu0 %5130, %v1016_v16  }
  0x78   : > { %1178 = vperm.xlu1 %5131, %v969_v18   ;;  %1166 = vperm.xlu0 %5130, %v968_v19   ;;  %v2775_v18 = vld [vmem:[%s7339_s4 + $0x24] sm:$0xf]  ;;  %v2774_v19 = vld [vmem:[%s7339_s4 + $0x20] sm:$0xf] }
  0x7a   : > { %5073 = vmatmul.mubr.msk.bf16.gmra.mrb[48].mxu0 %vm538_vm0, %v5157_v20 }
  0x7b   : > { %5076 = vmatprep.mubr.msk.bf16.mxu0 %vm538_vm0, %v5158_v22 }
  0x7c   : > { %1562 = vperm.xlu1 %5131, %v1001_v21   ;;  %1550 = vperm.xlu0 %5130, %v1000_v23   ;;  %v2793_v23 = vld [vmem:[%s7339_s4 + $0x6c] sm:$0xf] }
  0x80   : > { %1394 = vperm.xlu1 %5131, %v987_v24   ;;  %1382 = vperm.xlu0 %5130, %v986_v25   ;;  %v2792_v24 = vld [vmem:[%s7339_s4 + $0x68] sm:$0xf] }
  0x82   : > { %5077 = vmatmul.mubr.msk.bf16.gmra.mrb[52].mxu0 %vm538_vm0, %v5159_v26 }
  0x83   : > { %5080 = vmatprep.mubr.msk.bf16.mxu0 %vm538_vm0, %v5160_v28  ;;  %v2776_v28 = vld [vmem:[%s7339_s4 + $0x28] sm:$0xf] }
  0x84   : > { %1778 = vperm.xlu1 %5131, %v1019_v27   ;;  %1766 = vperm.xlu0 %5130, %v1018_v29   ;;  %v2777_v27 = vld [vmem:[%s7339_s4 + $0x2c] sm:$0xf] }
  0x88   : > { %1202 = vperm.xlu1 %5131, %v971_v30   ;;  %1190 = vperm.xlu0 %5130, %v970_v31   ;;  %v2795_v31 = vld [vmem:[%s7339_s4 + $0x74] sm:$0xf] }
  0x8a   : > { %5081 = vmatmul.mubr.msk.bf16.gmra.mrb[56].mxu0 %vm538_vm0, %v5161_v32  ;;  %v2794_v32 = vld [vmem:[%s7339_s4 + $0x70] sm:$0xf] }
  0x8b   : > { %5084 = vmatprep.mubr.msk.bf16.mxu0 %vm538_vm0, %v5162_v34 }
  0x8c   : > { %1586 = vperm.xlu1 %5131, %v1003_v33   ;;  %1574 = vperm.xlu0 %5130, %v1002_v35   ;;  %v2779_v35 = vld [vmem:[%s7339_s4 + $0x34] sm:$0xf] }
  0x8f   : > { %v5788_v38 = vpop.permute.xlu1 %1598  ;;  %v5790_v39 = vpop.permute.xlu0 %1214 }
  0x90   : > { %7347 = vst [vmem:[#allocation2_spill] sm:$0xff] %v5788_v38  ;;  %3004 = vperm.xlu1 %5131, %v2783_v36   ;;  %2992 = vperm.xlu0 %5130, %v2782_v37   ;;  %v2778_v36 = vld [vmem:[%s7339_s4 + $0x30] sm:$0xf] }
  0x92   : > { %5085 = vmatmul.mubr.msk.bf16.gmra.mrb[60].mxu0 %vm538_vm0, %v5163_v40 }
  0x93   : > { %v5801_v43 = vpop.permute.xlu1 %1610  ;;  %v5803_v44 = vpop.permute.xlu0 %1226 }
  0x94   : > { %7348 = vst [vmem:[#allocation3_spill] sm:$0xff] %v5801_v43  ;;  %2812 = vperm.xlu1 %5131, %v2767_v41   ;;  %2800 = vperm.xlu0 %5130, %v2766_v42   ;;  %v2797_v41 = vld [vmem:[%s7339_s4 + $0x7c] sm:$0xf]  ;;  %v2796_v42 = vld [vmem:[%s7339_s4 + $0x78] sm:$0xf] }
  0x97   : > { %v5812_v47 = vpop.permute.xlu1 %1034  ;;  %v5814_v48 = vpop.permute.xlu0 %1022 }
  0x98   : > { %3028 = vperm.xlu1 %5131, %v2785_v45   ;;  %3016 = vperm.xlu0 %5130, %v2784_v46  }
  0x9b   : > { %v5822_v51 = vpop.permute.xlu1 %1418  ;;  %v5824_v52 = vpop.permute.xlu0 %1406 }
  0x9c   : > { %7349 = vst [vmem:[#allocation4_spill] sm:$0xff] %v5822_v51  ;;  %7350 = vst [vmem:[#allocation5_spill] sm:$0xff] %v5824_v52  ;;  %2836 = vperm.xlu1 %5131, %v2769_v49   ;;  %2824 = vperm.xlu0 %5130, %v2768_v50   ;;  %v2781_v49 = vld [vmem:[%s7339_s4 + $0x3c] sm:$0xf]  ;;  %v2780_v50 = vld [vmem:[%s7339_s4 + $0x38] sm:$0xf] }
  0x9f   : > { %v5832_v55 = vpop.permute.xlu1 %1250  ;;  %v5834_v56 = vpop.permute.xlu0 %1238 }
  0xa0   : > { %3052 = vperm.xlu1 %5131, %v2787_v53   ;;  %3040 = vperm.xlu0 %5130, %v2786_v54  }
  0xa3   : > { %v5842_v59 = vpop.permute.xlu1 %1634  ;;  %v5844_v60 = vpop.permute.xlu0 %1622 }
  0xa4   : > { %7351 = vst [vmem:[#allocation6_spill] sm:$0xff] %v5842_v59  ;;  %7352 = vst [vmem:[#allocation7_spill] sm:$0xff] %v5844_v60  ;;  %2860 = vperm.xlu1 %5131, %v2771_v57   ;;  %2848 = vperm.xlu0 %5130, %v2770_v58  }
  0xa7   : > { %v5852_v3 = vpop.permute.xlu1 %1058  ;;  %v5854_v4 = vpop.permute.xlu0 %1046 }
  0xa8   : > { %3076 = vperm.xlu1 %5131, %v2789_v61   ;;  %3064 = vperm.xlu0 %5130, %v2788_v1   ;;  %v3343_v61 = vld [vmem:[%s7341_s6 + $0x8] sm:$0xff] }
  0xab   : > { %v5862_v9 = vpop.permute.xlu1 %1442  ;;  %v5864_v10 = vpop.permute.xlu0 %1430 }
  0xac   : > { %7353 = vst [vmem:[#allocation8_spill] sm:$0xff] %v5862_v9  ;;  %7354 = vst [vmem:[#allocation9_spill] sm:$0xff] %v5864_v10  ;;  %2884 = vperm.xlu1 %5131, %v2773_v5   ;;  %2872 = vperm.xlu0 %5130, %v2772_v8   ;;  %v3345_v5 = vld [vmem:[%s7341_s6 + $0x18] sm:$0xff]  ;;  %v1259_v9 = vrot.slane %v5832_v55, %v5869_v12 }
  0xaf   : > { %v1275_v14 = vpop.permute.xlu1 %1274  ;;  %v1263_v16 = vpop.permute.xlu0 %1262 }
  0xb0   : > { %v1283_v15 = vrot.slane %v1275_v14, %v5869_v12  ;;  %3100 = vperm.xlu1 %5131, %v2791_v11   ;;  %v1271_v17 = vrot.slane %v1263_v16, %v5869_v12  ;;  %3088 = vperm.xlu0 %5130, %v2790_v13   ;;  %v3347_v14 = vld [vmem:[%s7341_s6 + $0x28] sm:$0xff] }
  0xb2   : > { %v5882_v20 = vcombine.low %v1271_v17, %v1283_v15  ;;  %v3346_v15 = vld [vmem:[%s7341_s6 + $0x20] sm:$0xff] }
  0xb3   : > { %v5884_v21 = vpop.permute.xlu1 %1658  ;;  %v5886_v22 = vpop.permute.xlu0 %1646 }
  0xb4   : > { %7355 = vst [vmem:[#allocation10_spill] sm:$0xff] %v5884_v21  ;;  %7356 = vst [vmem:[#allocation11_spill] sm:$0xff] %v5886_v22  ;;  %2908 = vperm.xlu1 %5131, %v2775_v18   ;;  %2896 = vperm.xlu0 %5130, %v2774_v19   ;;  %v3349_v19 = vld [vmem:[%s7341_s6 + $0x38] sm:$0xff] }
  0xb7   : > { %v5894_v25 = vpop.permute.xlu1 %1082  ;;  %v5896_v26 = vpop.permute.xlu0 %1070 }
  0xb8   : > { %3124 = vperm.xlu1 %5131, %v2793_v23   ;;  %3112 = vperm.xlu0 %5130, %v2792_v24   ;;  %v3348_v23 = vld [vmem:[%s7341_s6 + $0x30] sm:$0xff] }
  0xbb   : > { %v5904_v29 = vpop.permute.xlu1 %1466  ;;  %v5906_v30 = vpop.permute.xlu0 %1454 }
  0xbc   : > { %7357 = vst [vmem:[#allocation12_spill] sm:$0xff] %v5904_v29  ;;  %7358 = vst [vmem:[#allocation13_spill] sm:$0xff] %v5906_v30  ;;  %2932 = vperm.xlu1 %5131, %v2777_v27   ;;  %2920 = vperm.xlu0 %5130, %v2776_v28   ;;  %v3370_v29 = vld [vmem:[%s7341_s6 + $0xe0] sm:$0xff] }
  0xbf   : > { %v5914_v33 = vpop.permute.xlu1 %1298  ;;  %v5916_v34 = vpop.permute.xlu0 %1286 }
  0xc0   : > { %3148 = vperm.xlu1 %5131, %v2795_v31   ;;  %3136 = vperm.xlu0 %5130, %v2794_v32   ;;  %v3351_v32 = vld [vmem:[%s7341_s6 + $0x48] sm:$0xff] }
  0xc3   : > { %v5924_v37 = vpop.permute.xlu1 %1682  ;;  %v5926_v40 = vpop.permute.xlu0 %1670 }
  0xc4   : > { %7359 = vst [vmem:[#allocation14_spill] sm:$0xff] %v5924_v37  ;;  %7360 = vst [vmem:[#allocation15_spill] sm:$0xff] %v5926_v40  ;;  %2956 = vperm.xlu1 %5131, %v2779_v35   ;;  %2944 = vperm.xlu0 %5130, %v2778_v36   ;;  %v3350_v35 = vld [vmem:[%s7341_s6 + $0x40] sm:$0xff]  ;;  %v3368_v40 = vld [vmem:[%s7341_s6 + $0xd0] sm:$0xff] }
  0xc7   : > { %v5934_v45 = vpop.permute.xlu1 %1106  ;;  %v5936_v46 = vpop.permute.xlu0 %1094 }
  0xc8   : > { %3172 = vperm.xlu1 %5131, %v2797_v41   ;;  %3160 = vperm.xlu0 %5130, %v2796_v42  }
  0xcb   : > { %v1491_v53 = vpop.permute.xlu1 %1490  ;;  %v1479_v57 = vpop.permute.xlu0 %1478 }
  0xcc   : > { %v1499_v54 = vrot.slane %v1491_v53, %v5869_v12  ;;  %2980 = vperm.xlu1 %5131, %v2781_v49   ;;  %v1487_v58 = vrot.slane %v1479_v57, %v5869_v12  ;;  %2968 = vperm.xlu0 %5130, %v2780_v50   ;;  %v3353_v49 = vld [vmem:[%s7341_s6 + $0x58] sm:$0xff]  ;;  %v3352_v50 = vld [vmem:[%s7341_s6 + $0x50] sm:$0xff] }
  0xce   : > { %v5952_v63 = vcombine.low %v1487_v58, %v1499_v54 }
  0xcf   : > { %v5954_v0 = vpop.permute.xlu1 %1322  ;;  %v5956_v1 = vpop.permute.xlu0 %1310 }
  0xd0   : > { %3381 = vperm.xlu1 %5131, %v3343_v61   ;;  %3376 = vperm.xlu0 %5130, %v3342_v62   ;;  %v3355_v61 = vld [vmem:[%s7341_s6 + $0x68] sm:$0xff]  ;;  %v3354_v62 = vld [vmem:[%s7341_s6 + $0x60] sm:$0xff] }
  0xd3   : > { %v1707_v7 = vpop.permute.xlu1 %1706  ;;  %v1695_v11 = vpop.permute.xlu0 %1694 }
  0xd4   : > { %v1715_v8 = vrot.slane %v1707_v7, %v5869_v12  ;;  %3391 = vperm.xlu1 %5131, %v3345_v5   ;;  %v1703_v13 = vrot.slane %v1695_v11, %v5869_v12  ;;  %3386 = vperm.xlu0 %5130, %v3344_v6   ;;  %v3356_v11 = vld [vmem:[%s7341_s6 + $0x70] sm:$0xff] }
  0xd6   : > { %v5972_v16 = vcombine.low %v1703_v13, %v1715_v8  ;;  %v3357_v8 = vld [vmem:[%s7341_s6 + $0x78] sm:$0xff] }
  0xd7   : > { %v5974_v17 = vpop.permute.xlu1 %1130  ;;  %v5976_v18 = vpop.permute.xlu0 %1118 }
  0xd8   : > { %7361 = vst [vmem:[#allocation16_spill] sm:$0xff] %v5972_v16  ;;  %3401 = vperm.xlu1 %5131, %v3347_v14   ;;  %3396 = vperm.xlu0 %5130, %v3346_v15  }
  0xdb   : > { %v1515_v24 = vpop.permute.xlu1 %1514  ;;  %v1503_v28 = vpop.permute.xlu0 %1502 }
  0xdc   : > { %v1523_v27 = vrot.slane %v1515_v24, %v5869_v12  ;;  %3411 = vperm.xlu1 %5131, %v3349_v19   ;;  %v1511_v31 = vrot.slane %v1503_v28, %v5869_v12  ;;  %3406 = vperm.xlu0 %5130, %v3348_v23   ;;  %v3359_v23 = vld [vmem:[%s7341_s6 + $0x88] sm:$0xff]  ;;  %v3358_v24 = vld [vmem:[%s7341_s6 + $0x80] sm:$0xff] }
  0xde   : > { %v5992_v36 = vcombine.low %v1511_v31, %v1523_v27 }
  0xdf   : > { %v5994_v41 = vpop.permute.xlu1 %1346  ;;  %v5996_v42 = vpop.permute.xlu0 %1334 }
  0xe0   : > { %3421 = vperm.xlu1 %5131, %v3351_v32   ;;  %3416 = vperm.xlu0 %5130, %v3350_v35  }
  0xe3   : > { %v1731_v53 = vpop.permute.xlu1 %1730  ;;  %v1719_v57 = vpop.permute.xlu0 %1718 }
  0xe4   : > { %v1739_v54 = vrot.slane %v1731_v53, %v5869_v12  ;;  %3431 = vperm.xlu1 %5131, %v3353_v49   ;;  %v1727_v58 = vrot.slane %v1719_v57, %v5869_v12  ;;  %3426 = vperm.xlu0 %5130, %v3352_v50   ;;  %v3361_v50 = vld [vmem:[%s7341_s6 + $0x98] sm:$0xff]  ;;  %v3360_v57 = vld [vmem:[%s7341_s6 + $0x90] sm:$0xff] }
  0xe5   : > { %v3364_v53 = vld [vmem:[%s7341_s6 + $0xb0] sm:$0xff] }
  0xe6   : > { %v6012_v5 = vcombine.low %v1727_v58, %v1739_v54 }
  0xe7   : > { %v6014_v6 = vpop.permute.xlu1 %1154  ;;  %v6016_v7 = vpop.permute.xlu0 %1142 }
  0xe8   : > { %7362 = vst [vmem:[#allocation17_spill] sm:$0xff] %v6012_v5  ;;  %3441 = vperm.xlu1 %5131, %v3355_v61   ;;  %3436 = vperm.xlu0 %5130, %v3354_v62   ;;  %v5166_v62 = vld [vmem:[%s7338_s3 + $0x4] ss:$16 sps:$4 sm:$0xff]  }
  0xe9   : > { %2460 = vmatprep.mubr.bf16.mxu1 %v5166_v62 }
  0xeb   : > { %v1539_v13 = vpop.permute.xlu1 %1538  ;;  %v1527_v15 = vpop.permute.xlu0 %1526 }
  0xec   : > { %v1547_v14 = vrot.slane %v1539_v13, %v5869_v12  ;;  %3451 = vperm.xlu1 %5131, %v3357_v8   ;;  %v1535_v19 = vrot.slane %v1527_v15, %v5869_v12  ;;  %3446 = vperm.xlu0 %5130, %v3356_v11   ;;  %v3362_v15 = vld [vmem:[%s7341_s6 + $0xa0] sm:$0xff] }
  0xed   : > { %v6034_v28 = vpop.f32.mrb[0].mxu0 }
  0xee   : > { %v6032_v27 = vcombine.low %v1535_v19, %v1547_v14  ;;  %v6040_v35 = vpop.f32.mrb[1].mxu0  ;;  %v3363_v14 = vld [vmem:[%s7341_s6 + $0xa8] sm:$0xff] }
  0xef   : > { %v6036_v31 = vpop.permute.xlu1 %1370  ;;  %v6038_v32 = vpop.permute.xlu0 %1358  ;;  %v5169_v19 = vld [vmem:[%s7338_s3 + $0xc] ss:$16 sps:$4 sm:$0xff]  }
  0xf0   : > { %3461 = vperm.xlu1 %5131, %v3359_v23   ;;  %3456 = vperm.xlu0 %5130, %v3358_v24   ;;  %v6042_v49 = vpop.f32.mrb[2].mxu0 }
  0xf1   : > { %v6049_v54 = vpop.f32.mrb[3].mxu0  ;;  %2621 = vmatprep.mubr.bf16.mxu0 %v5169_v19 }
  0xf2   : > { %v7366_v55 = vpack.c.bf16 %v6049_v54, %v6040_v35 }
  0xf3   : > { %v1755_v61 = vpop.permute.xlu1 %1754  ;;  %v1743_v11 = vpop.permute.xlu0 %1742 }
  0xf4   : > { %v1763_v8 = vrot.slane %v1755_v61, %v5869_v12  ;;  %3471 = vperm.xlu1 %5131, %v3361_v50   ;;  %v1751_v13 = vrot.slane %v1743_v11, %v5869_v12  ;;  %3466 = vperm.xlu0 %5130, %v3360_v57   ;;  %v3365_v11 = vld [vmem:[%s7341_s6 + $0xb8] sm:$0xff] }
  0xf5   : > { %v6072_v24 = vpop.f32.mrb[4].mxu0 }
  0xf6   : > { %v6070_v23 = vcombine.low %v1751_v13, %v1763_v8  ;;  %v6078_v61 = vpop.f32.mrb[5].mxu0  ;;  %v3367_v8 = vld [vmem:[%s7341_s6 + $0xc8] sm:$0xff] }
  0xf7   : > { %v6074_v50 = vpop.permute.xlu1 %1178  ;;  %v6076_v57 = vpop.permute.xlu0 %1166 }
  0xf8   : > { %7363 = vst [vmem:[#allocation18_spill] sm:$0xff] %v6070_v23  ;;  %3481 = vperm.xlu1 %5131, %v3363_v14   ;;  %3476 = vperm.xlu0 %5130, %v3362_v15   ;;  %v6080_v62 = vpop.f32.mrb[6].mxu0  ;;  %v3366_v23 = vld [vmem:[%s7341_s6 + $0xc0] sm:$0xff] }
  0xf9   : > { %v6087_v13 = vpop.f32.mrb[7].mxu0 }
  0xfb   : > { %v1563_v19 = vpop.permute.xlu1 %1562  ;;  %v1551_v2 = vpop.permute.xlu0 %1550 }
  0xfc   : > { %v1571_v15 = vrot.slane %v1563_v19, %v5869_v12  ;;  %3491 = vperm.xlu1 %5131, %v3365_v11   ;;  %v1559_v58 = vrot.slane %v1551_v2, %v5869_v12  ;;  %3486 = vperm.xlu0 %5130, %v3364_v53   ;;  %v3369_v53 = vld [vmem:[%s7341_s6 + $0xd8] sm:$0xff] }
  0xfd   : > { %v6104_v5 = vpop.f32.mrb[8].mxu0 }
  0xfe   : > { %v6102_v16 = vcombine.low %v1559_v58, %v1571_v15  ;;  %v6110_v11 = vpop.f32.mrb[9].mxu0  ;;  %v3371_v58 = vld [vmem:[%s7341_s6 + $0xe8] sm:$0xff] }
  0xff   : > { %v6106_v14 = vpop.permute.xlu1 %1394  ;;  %v6108_v19 = vpop.permute.xlu0 %1382 }
 0x100   : > { %7364 = vst [vmem:[#allocation19_spill] sm:$0xff] %v6102_v16  ;;  %3501 = vperm.xlu1 %5131, %v3367_v8   ;;  %3496 = vperm.xlu0 %5130, %v3366_v23   ;;  %v6112_v2 = vpop.f32.mrb[10].mxu0 }
 0x101   : > { %v6119_v15 = vpop.f32.mrb[11].mxu0 }
 0x103   : > { %v1779_v8 = vpop.permute.xlu1 %1778  ;;  %v1767_v22 = vpop.permute.xlu0 %1766 }
 0x104   : > { %v1787_v23 = vrot.slane %v1779_v8, %v5869_v12  ;;  %3511 = vperm.xlu1 %5131, %v3369_v53   ;;  %v1775_v30 = vrot.slane %v1767_v22, %v5869_v12  ;;  %3506 = vperm.xlu0 %5130, %v3368_v40   ;;  %v3373_v22 = vld [vmem:[%s7341_s6 + $0xf8] sm:$0xff]  ;;  %v1223_v40 = vrot.slane %v5790_v39, %v5869_v12 }
 0x105   : > { %v6136_v10 = vpop.f32.mrb[12].mxu0 }
 0x106   : > { %v6134_v21 = vcombine.low %v1775_v30, %v1787_v23  ;;  %v6138_v37 = vpop.f32.mrb[13].mxu0  ;;  %v3372_v30 = vld [vmem:[%s7341_s6 + $0xf0] sm:$0xff]  ;;  %v1247_v23 = vrot.slane %v5834_v56, %v5869_v12 }
 0x107   : > { %v6140_v53 = vpop.f32.mrb[14].mxu0 }
 0x108   : > { %7365 = vst [vmem:[#allocation20_spill] sm:$0xff] %v6134_v21  ;;  %3521 = vperm.xlu1 %5131, %v3371_v58   ;;  %3516 = vperm.xlu0 %5130, %v3370_v29   ;;  %v6147_v8 = vpop.f32.mrb[15].mxu0  ;;  %v1043_v29 = vrot.slane %v5812_v47, %v5869_v12  ;;  %v1031_v58 = vrot.slane %v5814_v48, %v5869_v12 }
 0x109   : > { %v1235_v21 = vrot.slane %v5803_v44, %v5869_v12  ;;  %v1067_v47 = vrot.slane %v5852_v3, %v5869_v12  ;;  %v1055_v48 = vrot.slane %v5854_v4, %v5869_v12  ;;  %v4450_v44 = vcombine.low %v1247_v23, %v1259_v9 }
 0x10a   : > { %v4441_v59 = vcombine.low %v1031_v58, %v1043_v29  ;;  %v1091_v3 = vrot.slane %v5894_v25, %v5869_v12  ;;  %v1079_v4 = vrot.slane %v5896_v26, %v5869_v12  ;;  %v1295_v9 = vrot.slane %v5916_v34, %v5869_v12 }
 0x10b   : > { %v4449_v38 = vcombine.low %v1223_v40, %v1235_v21  ;;  %v4442_v51 = vcombine.low %v1055_v48, %v1067_v47  ;;  %v7367_v21 = vmov 0   ;;  %v1103_v34 = vrot.slane %v5936_v46, %v5869_v12 }
 0x10c   : > { %3531 = vperm.xlu1 %5131, %v3373_v22   ;;  %3526 = vperm.xlu0 %5130, %v3372_v30   ;;  %v1980_v56 = vadd.bf16 %v4441_v59, %v7366_v55  ;;  %v7368_v59 = vpack.c.bf16 %v6042_v49, %v6034_v28  ;;  %v4443_v54 = vcombine.low %v1079_v4, %v1091_v3 }
 0x10d   : > { %v5042_v60 = vpop.f32.mrb[16].mxu0  ;;  %v1139_v46 = vrot.slane %v5974_v17, %v5869_v12 }
 0x10e   : > { %v733_v22 = vpop.f32.mrb[17].mxu0  ;;  %v1981_v35 = vadd.bf16 %v4442_v51, %v7368_v59  ;;  %v7369_v51 = vpack.c.bf16 %v6087_v13, %v6078_v61  ;;  %v1319_v61 = vrot.slane %v5956_v1, %v5869_v12  ;;  %v1355_v13 = vrot.slane %v5994_v41, %v5869_v12 }
 0x10f   : > { %v5043_v30 = vpop.f32.mrb[18].mxu0  ;;  %v1163_v41 = vrot.slane %v6014_v6, %v5869_v12 }
 0x110   : > { %v933_v39 = vpack.c.bf16 %v5043_v30, %v5042_v60  ;;  %v736_v43 = vpop.f32.mrb[19].mxu0  ;;  %v1307_v60 = vrot.slane %v5914_v33, %v5869_v12  ;;  %v1115_v33 = vrot.slane %v5934_v45, %v5869_v12  ;;  %v1982_v49 = vadd.bf16 %v4443_v54, %v7369_v51 }
 0x111   : > { %v932_v52 = vpack.c.bf16 %v736_v43, %v733_v22  ;;  %v2013_v48 = vmax.bf16 %v7367_v21, %v1981_v35  ;;  %v1331_v45 = vrot.slane %v5954_v0, %v5869_v12  ;;  %v7370_v0 = vpack.c.bf16 %v6080_v62, %v6072_v24  ;;  %v1203_v35 = vpop.permute.xlu1 %1202 }
 0x112   : > { %v1989_v16 = vadd.bf16 %v4450_v44, %v933_v39  ;;  %v4452_v47 = vcombine.low %v1295_v9, %v1307_v60  ;;  %v4444_v30 = vcombine.low %v1103_v34, %v1115_v33  ;;  %v1127_v39 = vrot.slane %v5976_v18, %v5869_v12 }
 0x113   : > { %v1988_v29 = vadd.bf16 %v4449_v38, %v932_v52  ;;  %v2012_v52 = vmax.bf16 %v7367_v21, %v1980_v56  ;;  %v2014_v18 = vmax.bf16 %v7367_v21, %v1982_v49  ;;  %v4453_v9 = vcombine.low %v1319_v61, %v1331_v45 }
 0x114   : > { %v2021_v26 = vmax.bf16 %v7367_v21, %v1989_v16  ;;  %v1983_v17 = vadd.bf16 %v4444_v30, %v7370_v0  ;;  %v4445_v3 = vcombine.low %v1127_v39, %v1139_v46  ;;  %v1175_v54 = vrot.slane %v6076_v57, %v5869_v12 }
 0x115   : > { %v5046_v43 = vpop.f32.mrb[20].mxu0  ;;  %v2020_v40 = vmax.bf16 %v7367_v21, %v1988_v29  ;;  %v1391_v33 = vrot.slane %v6108_v19, %v5869_v12 }
 0x116   : > { %v749_v38 = vpop.f32.mrb[21].mxu0  ;;  %v2015_v59 = vmax.bf16 %v7367_v21, %v1983_v17 }
 0x117   : > { %v5047_v25 = vpop.f32.mrb[22].mxu0  ;;  %4686 = vmatprep.subr.bf16.mxu1 %v2020_v40 }
 0x118   : > { %v935_v23 = vpack.c.bf16 %v5047_v25, %v5046_v43  ;;  %v752_v58 = vpop.f32.mrb[23].mxu0  ;;  %4687 = vmatpush3.bf16.msra.mxu1 %v2012_v52  ;;  %v7371_v43 = vpack.c.bf16 %v6119_v15, %v6110_v11  ;;  %v1367_v11 = vrot.slane %v6038_v32, %v5869_v12  ;;  %v1403_v15 = vrot.slane %v6106_v14, %v5869_v12 }
 0x119   : > { %v934_v28 = vpack.c.bf16 %v752_v58, %v749_v38  ;;  %4688 = vmatprep.subr.bf16.mxu1 %v2021_v26  ;;  %v1191_v38 = vpop.permute.xlu0 %1190  ;;  %v1187_v26 = vrot.slane %v6074_v50, %v5869_v12  ;;  %v1211_v58 = vrot.slane %v1203_v35, %v5869_v12 }
 0x11a   : > { %v1991_v16 = vadd.bf16 %v4452_v47, %v935_v23  ;;  %v1984_v40 = vadd.bf16 %v4445_v3, %v7371_v43  ;;  %v1199_v57 = vrot.slane %v1191_v38, %v5869_v12 }
 0x11b   : > { %v1990_v22 = vadd.bf16 %v5882_v20, %v934_v28  ;;  %v1343_v20 = vrot.slane %v5996_v42, %v5869_v12  ;;  %v1151_v42 = vrot.slane %v6016_v7, %v5869_v12  ;;  %v1379_v7 = vrot.slane %v6036_v31, %v5869_v12 }
 0x11c   : > { %4689 = vmatpush3.bf16.msra.mxu1 %v2013_v48  ;;  %v2023_v1 = vmax.bf16 %v7367_v21, %v1991_v16  ;;  %v7372_v31 = vpack.c.bf16 %v6112_v2, %v6104_v5  ;;  %v2016_v32 = vmax.bf16 %v7367_v21, %v1984_v40  ;;  %v4447_v51 = vcombine.low %v1175_v54, %v1187_v26 }
 0x11d   : > { %v5050_v44 = vpop.f32.mrb[24].mxu0  ;;  %v2022_v55 = vmax.bf16 %v7367_v21, %v1990_v22  ;;  %v4454_v24 = vcombine.low %v1343_v20, %v1355_v13  ;;  %v4446_v25 = vcombine.low %v1151_v42, %v1163_v41  ;;  %v4455_v48 = vcombine.low %v1367_v11, %v1379_v7  ;;  %v5182_v7 = vld [vmem:[%s7338_s3 + $0x64] ss:$16 sps:$4 sm:$0xff]  }
 0x11e   : > { %v765_v56 = vpop.f32.mrb[25].mxu0  ;;  %v4456_v16 = vcombine.low %v1391_v33, %v1403_v15  ;;  %v4448_v5 = vcombine.low %v1199_v57, %v1211_v58  ;;  %v7373_v2 = vpack.c.bf16 %v6147_v8, %v6138_v37  ;;  %v7374_v20 = vpack.c.bf16 %v6140_v53, %v6136_v10  ;;  %v5164_v53 = vld [vmem:[%s7338_s3] ss:$16 sps:$4 sm:$0xff]   ;;  %v7375_v33 = vld [vmem:[#allocation19_spill] sm:$0xff]  ;;  %v7377_v58 = vld [vmem:[#allocation5_spill] sm:$0xff] }
 0x11f   : > { %v5051_v29 = vpop.f32.mrb[26].mxu0  ;;  %4690 = vmatprep.subr.bf16.mxu1 %v2022_v55  ;;  %v1985_v50 = vadd.bf16 %v4446_v25, %v7372_v31  ;;  %v5180_v25 = vld [vmem:[%s7338_s3 + $0x40] ss:$16 sps:$4 sm:$0xff]   ;;  %v1415_v57 = vrot.slane %v7377_v58, %v5869_v12 }
 0x120   : > { %v937_v4 = vpack.c.bf16 %v5051_v29, %v5050_v44  ;;  %v768_v60 = vpop.f32.mrb[27].mxu0  ;;  %4691 = vmatpush3.bf16.msra.mxu1 %v2014_v18  ;;  %v1986_v30 = vadd.bf16 %v4447_v51, %v7373_v2  ;;  %v1987_v44 = vadd.bf16 %v4448_v5, %v7374_v20  ;;  %v5170_v29 = vld [vmem:[%s7338_s3 + $0x24] ss:$16 sps:$4 sm:$0xff]  }
 0x121   : > { %v936_v62 = vpack.c.bf16 %v768_v60, %v765_v56  ;;  %4692 = vmatprep.subr.bf16.mxu1 %v2023_v1  ;;  %v2017_v45 = vmax.bf16 %v7367_v21, %v1985_v50  ;;  %v7376_v31 = vld [vmem:[#allocation4_spill] sm:$0xff] }
 0x122   : > { %v1993_v52 = vadd.bf16 %v4454_v24, %v937_v4  ;;  %v2018_v0 = vmax.bf16 %v7367_v21, %v1986_v30  ;;  %v2019_v10 = vmax.bf16 %v7367_v21, %v1987_v44  ;;  %v5174_v24 = vld [vmem:[%s7338_s3 + $0x20] ss:$16 sps:$4 sm:$0xff]   ;;  %v1427_v50 = vrot.slane %v7376_v31, %v5869_v12 }
 0x123   : > { %v1992_v6 = vadd.bf16 %v4453_v9, %v936_v62  ;;  %v5176_v62 = vld [vmem:[%s7338_s3 + $0x44] ss:$16 sps:$4 sm:$0xff]  }
 0x124   : > { %4693 = vmatpush3.bf16.msra.mxu1 %v2015_v59  ;;  %v2025_v14 = vmax.bf16 %v7367_v21, %v1993_v52  ;;  %v4457_v30 = vcombine.low %v1415_v57, %v1427_v50 }
 0x125   : > { %v5054_v34 = vpop.f32.mrb[28].mxu0  ;;  %v2024_v23 = vmax.bf16 %v7367_v21, %v1992_v6 }
 0x126   : > { %v781_v47 = vpop.f32.mrb[29].mxu0 }
 0x127   : > { %v5055_v28 = vpop.f32.mrb[30].mxu0  ;;  %4694 = vmatprep.subr.bf16.mxu1 %v2024_v23  ;;  %v5186_v23 = vld [vmem:[%s7338_s3 + $0x60] ss:$16 sps:$4 sm:$0xff]  }
 0x128   : > { %v939_v19 = vpack.c.bf16 %v5055_v28, %v5054_v34  ;;  %v784_v49 = vpop.f32.mrb[31].mxu0  ;;  %4695 = vmatpush3.bf16.msra.mxu1 %v2016_v32  ;;  %v7378_v32 = vld [vmem:[#allocation2_spill] sm:$0xff] }
 0x129   : > { %v938_v22 = vpack.c.bf16 %v784_v49, %v781_v47  ;;  %4696 = vmatprep.subr.bf16.mxu1 %v2025_v14  ;;  %v5188_v47 = vld [vmem:[%s7338_s3 + $0x84] ss:$16 sps:$4 sm:$0xff]   ;;  %v1607_v28 = vrot.slane %v7378_v32, %v5869_v12  ;;  %v7379_v14 = vld [vmem:[#allocation3_spill] sm:$0xff] }
 0x12a   : > { %v1995_v46 = vadd.bf16 %v4456_v16, %v939_v19  ;;  %v1619_v51 = vrot.slane %v7379_v14, %v5869_v12  ;;  %v7380_v19 = vld [vmem:[#allocation6_spill] sm:$0xff] }
 0x12b   : > { %v1994_v39 = vadd.bf16 %v4455_v48, %v938_v22  ;;  %v1643_v49 = vrot.slane %v7380_v19, %v5869_v12  ;;  %v7381_v48 = vld [vmem:[#allocation7_spill] sm:$0xff]  ;;  %v5198_v19 = vld [vmem:[%s7338_s3 + $0xa0] ss:$16 sps:$4 sm:$0xff]  }
 0x12c   : > { %4697 = vmatpush3.bf16.msra.mxu1 %v2017_v45  ;;  %v2027_v37 = vmax.bf16 %v7367_v21, %v1995_v46  ;;  %v1631_v16 = vrot.slane %v7381_v48, %v5869_v12  ;;  %v7382_v45 = vld [vmem:[#allocation8_spill] sm:$0xff] }
 0x12d   : > { %v6246_v61 = vpop.f32.mrb[32].mxu0  ;;  %v2026_v13 = vmax.bf16 %v7367_v21, %v1994_v39  ;;  %v1451_v46 = vrot.slane %v7382_v45, %v5869_v12  ;;  %v7383_v39 = vld [vmem:[#allocation9_spill] sm:$0xff] }
 0x12e   : > { %v6252_v55 = vpop.f32.mrb[33].mxu0 }
 0x12f   : > { %v6255_v17 = vpop.f32.mrb[34].mxu0  ;;  %4698 = vmatprep.subr.bf16.mxu1 %v2026_v13  ;;  %v1439_v13 = vrot.slane %v7383_v39, %v5869_v12 }
 0x130   : > { %v941_v8 = vpack.c.bf16 %v6255_v17, %v6246_v61  ;;  %v800_v56 = vpop.f32.mrb[35].mxu0  ;;  %4699 = vmatpush3.bf16.msra.mxu1 %v2018_v0  ;;  %v4466_v0 = vcombine.low %v1631_v16, %v1643_v49  ;;  %v5200_v49 = vld [vmem:[%s7338_s3 + $0xc4] ss:$16 sps:$4 sm:$0xff]  }
 0x131   : > { %v940_v18 = vpack.c.bf16 %v800_v56, %v6252_v55  ;;  %4700 = vmatprep.subr.bf16.mxu1 %v2027_v37  ;;  %v4465_v55 = vcombine.low %v1607_v28, %v1619_v51 }
 0x133   : > { %v1996_v56 = vadd.bf16 %v4457_v30, %v940_v18  ;;  %v5194_v18 = vld [vmem:[%s7338_s3 + $0xa4] ss:$16 sps:$4 sm:$0xff]  }
 0x134   : > { %4701 = vmatpush3.bf16.msra.mxu1 %v2019_v10 }
 0x135   : > { %v5062_v1 = vpop.f32.mrb[36].mxu0 }
 0x136   : > { %v6268_v3 = vpop.f32.mrb[37].mxu0 }
 0x137   : > { %v5063_v41 = vpop.f32.mrb[38].mxu0  ;;  %2461 = vmatmul.mubr.bf16.vlgmr.msra.gmra.mrb[0].mxu1 %v5164_v53 }
 0x138   : > { %v943_v42 = vpack.c.bf16 %v5063_v41, %v5062_v1  ;;  %v6270_v4 = vpop.f32.mrb[39].mxu0  ;;  %2468 = vmatprep.mubr.bf16.mxu1 %v5170_v29  ;;  %v5192_v29 = vld [vmem:[%s7338_s3 + $0x80] ss:$16 sps:$4 sm:$0xff]   ;;  %v4458_v1 = vcombine.low %v1439_v13, %v1451_v46  ;;  %v7390_v46 = vld [vmem:[#allocation17_spill] sm:$0xff] }
 0x139   : > { %v942_v60 = vpack.c.bf16 %v6270_v4, %v6268_v3  ;;  %v7384_v41 = vld [vmem:[#allocation10_spill] sm:$0xff]  ;;  %v7391_v13 = vld [vmem:[#allocation16_spill] sm:$0xff] }
 0x13a   : > { %v6275_v9 = vadd.bf16 %v5952_v63, %v943_v42  ;;  %v1667_v42 = vrot.slane %v7384_v41, %v5869_v12 }
 0x13c   : > { %v2031_v45 = vmax.bf16 %v7367_v21, %v6275_v9 }
 0x13d   : > { %v5066_v43 = vpop.f32.mrb[40].mxu0 }
 0x13e   : > { %v829_v40 = vpop.f32.mrb[41].mxu0 }
 0x13f   : > { %v5067_v59 = vpop.f32.mrb[42].mxu0  ;;  %2469 = vmatmul.mubr.bf16.gmra.mrb[4].mxu1 %v5174_v24  ;;  %v7385_v24 = vld [vmem:[#allocation12_spill] sm:$0xff] }
 0x140   : > { %v945_v35 = vpack.c.bf16 %v5067_v59, %v5066_v43  ;;  %v832_v38 = vpop.f32.mrb[43].mxu0  ;;  %2476 = vmatprep.mubr.bf16.mxu1 %v5176_v62  ;;  %v1475_v62 = vrot.slane %v7385_v24, %v5869_v12  ;;  %v7386_v43 = vld [vmem:[#allocation13_spill] sm:$0xff]  ;;  %v7387_v59 = vld [vmem:[#allocation11_spill] sm:$0xff] }
 0x141   : > { %v944_v52 = vpack.c.bf16 %v832_v38, %v829_v40  ;;  %v1463_v40 = vrot.slane %v7386_v43, %v5869_v12  ;;  %v7388_v38 = vld [vmem:[#allocation14_spill] sm:$0xff] }
 0x142   : > { %v6284_v6 = vadd.bf16 %v6032_v27, %v945_v35  ;;  %v1655_v35 = vrot.slane %v7387_v59, %v5869_v12  ;;  %v7393_v59 = vld [vmem:[#allocation18_spill] sm:$0xff] }
 0x143   : > { %v6287_v63 = vadd.bf16 %v5992_v36, %v944_v52  ;;  %v1691_v52 = vrot.slane %v7388_v38, %v5869_v12  ;;  %v4459_v58 = vcombine.low %v1463_v40, %v1475_v62  ;;  %v5210_v38 = vld [vmem:[%s7338_s3 + $0xe0] ss:$16 sps:$4 sm:$0xff]  }
 0x144   : > { %v4467_v32 = vcombine.low %v1655_v35, %v1667_v42  ;;  %v2033_v40 = vmax.bf16 %v7367_v21, %v6284_v6 }
 0x145   : > { %v6295_v26 = vpop.f32.mrb[44].mxu0  ;;  %v1998_v17 = vadd.bf16 %v4459_v58, %v942_v60  ;;  %v2032_v9 = vmax.bf16 %v7367_v21, %v6287_v63  ;;  %v7392_v63 = vld [vmem:[#allocation20_spill] sm:$0xff]  ;;  %v5181_v58 = vld [vmem:[%s7338_s3 + $0x48] ss:$16 sps:$4 sm:$0xff]  }
 0x146   : > { %v845_v54 = vpop.f32.mrb[45].mxu0 }
 0x147   : > { %v6297_v11 = vpop.f32.mrb[46].mxu0  ;;  %2477 = vmatmul.mubr.bf16.gmra.mrb[8].mxu1 %v5180_v25  ;;  %v7389_v25 = vld [vmem:[#allocation15_spill] sm:$0xff] }
 0x148   : > { %v947_v27 = vpack.c.bf16 %v6297_v11, %v6295_v26  ;;  %v848_v15 = vpop.f32.mrb[47].mxu0  ;;  %2484 = vmatprep.mubr.bf16.mxu1 %v5182_v7  ;;  %v1679_v7 = vrot.slane %v7389_v25, %v5869_v12  ;;  %v5212_v25 = vld [vmem:[%s7338_s3 + $0x104] ss:$16 sps:$4 sm:$0xff]   ;;  %v5216_v26 = vld [vmem:[%s7338_s3 + $0x100] ss:$16 sps:$4 sm:$0xff]  }
 0x149   : > { %v946_v36 = vpack.c.bf16 %v848_v15, %v845_v54  ;;  %v5172_v11 = vld [vmem:[%s7338_s3 + $0x2c] ss:$16 sps:$4 sm:$0xff]  }
 0x14a   : > { %v4468_v28 = vcombine.low %v1679_v7, %v1691_v52 }
 0x14b   : > { %v6302_v34 = vadd.bf16 %v7375_v33, %v946_v36  ;;  %v1997_v36 = vadd.bf16 %v4458_v1, %v941_v8  ;;  %v2028_v33 = vmax.bf16 %v7367_v21, %v1996_v56 }
 0x14d   : > { %v5074_v22 = vpop.f32.mrb[48].mxu0  ;;  %v2029_v61 = vmax.bf16 %v7367_v21, %v1997_v36 }
 0x14e   : > { %v861_v5 = vpop.f32.mrb[49].mxu0 }
 0x14f   : > { %v5075_v2 = vpop.f32.mrb[50].mxu0  ;;  %2485 = vmatmul.mubr.bf16.gmra.mrb[12].mxu1 %v5186_v23 }
 0x150   : > { %v949_v20 = vpack.c.bf16 %v5075_v2, %v5074_v22  ;;  %v864_v44 = vpop.f32.mrb[51].mxu0  ;;  %2492 = vmatprep.mubr.bf16.mxu1 %v5188_v47  ;;  %v2030_v22 = vmax.bf16 %v7367_v21, %v1998_v17  ;;  %v5236_v17 = vld [vmem:[%s7338_s3 + $0x184] ss:$16 sps:$4 sm:$0xff]  }
 0x151   : > { %v948_v37 = vpack.c.bf16 %v864_v44, %v861_v5  ;;  %v5204_v44 = vld [vmem:[%s7338_s3 + $0xc0] ss:$16 sps:$4 sm:$0xff]  }
 0x152   : > { %v2005_v10 = vadd.bf16 %v4466_v0, %v949_v20  ;;  %v5206_v0 = vld [vmem:[%s7338_s3 + $0xe4] ss:$16 sps:$4 sm:$0xff]  }
 0x153   : > { %v2004_v53 = vadd.bf16 %v4465_v55, %v948_v37  ;;  %v1587_v55 = vpop.permute.xlu1 %1586  ;;  %v1575_v37 = vpop.permute.xlu0 %1574 }
 0x154   : > { %v2037_v50 = vmax.bf16 %v7367_v21, %v2005_v10  ;;  %v1595_v41 = vrot.slane %v1587_v55, %v5869_v12  ;;  %v1583_v42 = vrot.slane %v1575_v37, %v5869_v12  ;;  %v5229_v55 = vld [vmem:[%s7338_s3 + $0x148] ss:$16 sps:$4 sm:$0xff]  }
 0x155   : > { %v5078_v54 = vpop.f32.mrb[52].mxu0  ;;  %v2036_v15 = vmax.bf16 %v7367_v21, %v2004_v53  ;;  %v5235_v37 = vld [vmem:[%s7338_s3 + $0x168] ss:$16 sps:$4 sm:$0xff]  }
 0x156   : > { %v877_v23 = vpop.f32.mrb[53].mxu0  ;;  %v4464_v52 = vcombine.low %v1583_v42, %v1595_v41  ;;  %v5256_v41 = vld [vmem:[%s7338_s3 + $0x1ec] ss:$16 sps:$4 sm:$0xff]   ;;  %v5259_v42 = vld [vmem:[%s7338_s3 + $0x1e8] ss:$16 sps:$4 sm:$0xff]  }
 0x157   : > { %v5079_v31 = vpop.f32.mrb[54].mxu0  ;;  %4798 = vmatprep.subr.bf16.mxu0 %v2036_v15  ;;  %2493 = vmatmul.mubr.bf16.gmra.mrb[16].mxu1 %v5192_v29 }
 0x158   : > { %v951_v57 = vpack.c.bf16 %v5079_v31, %v5078_v54  ;;  %v880_v47 = vpop.f32.mrb[55].mxu0  ;;  %4799 = vmatpush3.bf16.msra.mxu0 %v2028_v33  ;;  %2500 = vmatprep.mubr.bf16.mxu1 %v5194_v18  ;;  %v2003_v6 = vadd.bf16 %v4464_v52, %v947_v27  ;;  %v2034_v54 = vmax.bf16 %v7367_v21, %v6302_v34  ;;  %v5167_v33 = vld [vmem:[%s7338_s3 + $0x8] ss:$16 sps:$4 sm:$0xff]   ;;  %v5218_v27 = vld [vmem:[%s7338_s3 + $0x124] ss:$16 sps:$4 sm:$0xff]  }
 0x159   : > { %v950_v14 = vpack.c.bf16 %v880_v47, %v877_v23  ;;  %4800 = vmatprep.subr.bf16.mxu0 %v2037_v50  ;;  %v5175_v34 = vld [vmem:[%s7338_s3 + $0x28] ss:$16 sps:$4 sm:$0xff]   ;;  %v5222_v23 = vld [vmem:[%s7338_s3 + $0x120] ss:$16 sps:$4 sm:$0xff]   ;;  %v5178_v31 = vld [vmem:[%s7338_s3 + $0x4c] ss:$16 sps:$4 sm:$0xff]  }
 0x15a   : > { %v2007_v8 = vadd.bf16 %v4468_v28, %v951_v57  ;;  %v2035_v36 = vmax.bf16 %v7367_v21, %v2003_v6  ;;  %v5224_v50 = vld [vmem:[%s7338_s3 + $0x144] ss:$16 sps:$4 sm:$0xff]   ;;  %v5228_v57 = vld [vmem:[%s7338_s3 + $0x140] ss:$16 sps:$4 sm:$0xff]   ;;  %v5184_v47 = vld [vmem:[%s7338_s3 + $0x6c] ss:$16 sps:$4 sm:$0xff]  }
 0x15b   : > { %v2006_v51 = vadd.bf16 %v4467_v32, %v950_v14  ;;  %v5230_v32 = vld [vmem:[%s7338_s3 + $0x164] ss:$16 sps:$4 sm:$0xff]   ;;  %v5187_v28 = vld [vmem:[%s7338_s3 + $0x68] ss:$16 sps:$4 sm:$0xff]   ;;  %v5234_v14 = vld [vmem:[%s7338_s3 + $0x160] ss:$16 sps:$4 sm:$0xff]  }
 0x15c   : > { %4801 = vmatpush3.bf16.msra.mxu0 %v2029_v61  ;;  %v2039_v3 = vmax.bf16 %v7367_v21, %v2007_v8  ;;  %v5190_v61 = vld [vmem:[%s7338_s3 + $0x8c] ss:$16 sps:$4 sm:$0xff]   ;;  %v5193_v8 = vld [vmem:[%s7338_s3 + $0x88] ss:$16 sps:$4 sm:$0xff]  }
 0x15d   : > { %v5082_v48 = vpop.f32.mrb[56].mxu0  ;;  %v2038_v16 = vmax.bf16 %v7367_v21, %v2006_v51  ;;  %v5240_v51 = vld [vmem:[%s7338_s3 + $0x180] ss:$16 sps:$4 sm:$0xff]  }
 0x15e   : > { %v893_v5 = vpop.f32.mrb[57].mxu0 }
 0x15f   : > { %v5083_v2 = vpop.f32.mrb[58].mxu0  ;;  %4802 = vmatprep.subr.bf16.mxu0 %v2038_v16  ;;  %2501 = vmatmul.mubr.bf16.gmra.mrb[20].mxu1 %v5198_v19  ;;  %v5196_v19 = vld [vmem:[%s7338_s3 + $0xac] ss:$16 sps:$4 sm:$0xff]   ;;  %v5246_v16 = vld [vmem:[%s7338_s3 + $0x1a0] ss:$16 sps:$4 sm:$0xff]  }
 0x160   : > { %v953_v4 = vpack.c.bf16 %v5083_v2, %v5082_v48  ;;  %v896_v60 = vpop.f32.mrb[59].mxu0  ;;  %4803 = vmatpush3.bf16.msra.mxu0 %v2030_v22  ;;  %2508 = vmatprep.mubr.bf16.mxu1 %v5200_v49  ;;  %v5242_v49 = vld [vmem:[%s7338_s3 + $0x1a4] ss:$16 sps:$4 sm:$0xff]   ;;  %v5199_v48 = vld [vmem:[%s7338_s3 + $0xa8] ss:$16 sps:$4 sm:$0xff]  }
 0x161   : > { %v952_v30 = vpack.c.bf16 %v896_v60, %v893_v5  ;;  %4804 = vmatprep.subr.bf16.mxu0 %v2039_v3  ;;  %v5202_v22 = vld [vmem:[%s7338_s3 + $0xcc] ss:$16 sps:$4 sm:$0xff]   ;;  %v5248_v5 = vld [vmem:[%s7338_s3 + $0x1c4] ss:$16 sps:$4 sm:$0xff]   ;;  %v5205_v2 = vld [vmem:[%s7338_s3 + $0xc8] ss:$16 sps:$4 sm:$0xff]  }
 0x162   : > { %v2009_v39 = vadd.bf16 %v7390_v46, %v953_v4  ;;  %v5252_v3 = vld [vmem:[%s7338_s3 + $0x1c0] ss:$16 sps:$4 sm:$0xff]   ;;  %v5208_v4 = vld [vmem:[%s7338_s3 + $0xec] ss:$16 sps:$4 sm:$0xff]   ;;  %v5254_v60 = vld [vmem:[%s7338_s3 + $0x1e4] ss:$16 sps:$4 sm:$0xff]  }
 0x163   : > { %v2008_v20 = vadd.bf16 %v7391_v13, %v952_v30  ;;  %v5211_v30 = vld [vmem:[%s7338_s3 + $0xe8] ss:$16 sps:$4 sm:$0xff]   ;;  %v5214_v46 = vld [vmem:[%s7338_s3 + $0x10c] ss:$16 sps:$4 sm:$0xff]  }
 0x164   : > { %4805 = vmatpush3.bf16.msra.mxu0 %v2031_v45  ;;  %v2041_v1 = vmax.bf16 %v7367_v21, %v2009_v39  ;;  %v5258_v45 = vld [vmem:[%s7338_s3 + $0x1e0] ss:$16 sps:$4 sm:$0xff]   ;;  %v5217_v39 = vld [vmem:[%s7338_s3 + $0x108] ss:$16 sps:$4 sm:$0xff]   ;;  %v5220_v13 = vld [vmem:[%s7338_s3 + $0x12c] ss:$16 sps:$4 sm:$0xff]  }
 0x165   : > { %v5086_v56 = vpop.f32.mrb[60].mxu0  ;;  %v2040_v10 = vmax.bf16 %v7367_v21, %v2008_v20  ;;  %v5223_v20 = vld [vmem:[%s7338_s3 + $0x128] ss:$16 sps:$4 sm:$0xff]  }
 0x166   : > { %v909_v53 = vpop.f32.mrb[61].mxu0 }
 0x167   : > { %v5087_v29 = vpop.f32.mrb[62].mxu0  ;;  %4806 = vmatprep.subr.bf16.mxu0 %v2040_v10  ;;  %2509 = vmatmul.mubr.bf16.gmra.mrb[24].mxu1 %v5204_v44  ;;  %v5226_v44 = vld [vmem:[%s7338_s3 + $0x14c] ss:$16 sps:$4 sm:$0xff]   ;;  %v5241_v10 = vld [vmem:[%s7338_s3 + $0x188] ss:$16 sps:$4 sm:$0xff]  }
 0x168   : > { %v955_v24 = vpack.c.bf16 %v5087_v29, %v5086_v56  ;;  %v912_v62 = vpop.f32.mrb[63].mxu0  ;;  %4807 = vmatpush3.bf16.msra.mxu0 %v2032_v9  ;;  %2516 = vmatprep.mubr.bf16.mxu1 %v5206_v0  ;;  %v5232_v0 = vld [vmem:[%s7338_s3 + $0x16c] ss:$16 sps:$4 sm:$0xff]  }
 0x169   : > { %v954_v43 = vpack.c.bf16 %v912_v62, %v909_v53  ;;  %4808 = vmatprep.subr.bf16.mxu0 %v2041_v1  ;;  %v5238_v56 = vld [vmem:[%s7338_s3 + $0x18c] ss:$16 sps:$4 sm:$0xff]   ;;  %v5247_v53 = vld [vmem:[%s7338_s3 + $0x1a8] ss:$16 sps:$4 sm:$0xff]  }
 0x16a   : > { %v2011_v18 = vadd.bf16 %v7392_v63, %v955_v24  ;;  %v5244_v9 = vld [vmem:[%s7338_s3 + $0x1ac] ss:$16 sps:$4 sm:$0xff]   ;;  %v5253_v1 = vld [vmem:[%s7338_s3 + $0x1c8] ss:$16 sps:$4 sm:$0xff]  }
 0x16b   : > { %v2010_v35 = vadd.bf16 %v7393_v59, %v954_v43  ;;  %v5250_v29 = vld [vmem:[%s7338_s3 + $0x1cc] ss:$16 sps:$4 sm:$0xff]  }
 0x16c   : > { %4809 = vmatpush3.bf16.msra.mxu0 %v2033_v40  ;;  %v2043_v15 = vmax.bf16 %v7367_v21, %v2011_v18 }
 0x16d   : > { %v2042_v7 = vmax.bf16 %v7367_v21, %v2010_v35 }
 0x16f   : > { %4810 = vmatprep.subr.bf16.mxu0 %v2042_v7  ;;  %2517 = vmatmul.mubr.bf16.gmra.mrb[28].mxu1 %v5210_v38 }
 0x170   : > { %4811 = vmatpush3.bf16.msra.mxu0 %v2034_v54  ;;  %2524 = vmatprep.mubr.bf16.mxu1 %v5212_v25 }
 0x171   : > { %4812 = vmatprep.subr.bf16.mxu0 %v2043_v15 }
 0x174   : > { %4813 = vmatpush3.bf16.msra.mxu0 %v2035_v36 }
 0x177   : > { %2622 = vmatmul.mubr.bf16.vlgmr.msra.gmra.mrb[64].mxu0 %v5167_v33  ;;  %2525 = vmatmul.mubr.bf16.gmra.mrb[32].mxu1 %v5216_v26 }
 0x178   : > { %2629 = vmatprep.mubr.bf16.mxu0 %v5172_v11  ;;  %2532 = vmatprep.mubr.bf16.mxu1 %v5218_v27 }
 0x17f   : > { %2630 = vmatmul.mubr.bf16.gmra.mrb[68].mxu0 %v5175_v34  ;;  %2533 = vmatmul.mubr.bf16.gmra.mrb[36].mxu1 %v5222_v23 }
 0x180   : > { %2637 = vmatprep.mubr.bf16.mxu0 %v5178_v31  ;;  %2540 = vmatprep.mubr.bf16.mxu1 %v5224_v50 }
 0x187   : > { %2638 = vmatmul.mubr.bf16.gmra.mrb[72].mxu0 %v5181_v58  ;;  %2541 = vmatmul.mubr.bf16.gmra.mrb[40].mxu1 %v5228_v57 }
 0x188   : > { %2645 = vmatprep.mubr.bf16.mxu0 %v5184_v47  ;;  %2548 = vmatprep.mubr.bf16.mxu1 %v5230_v32 }
 0x18f   : > { %2646 = vmatmul.mubr.bf16.gmra.mrb[76].mxu0 %v5187_v28  ;;  %2549 = vmatmul.mubr.bf16.gmra.mrb[44].mxu1 %v5234_v14 }
 0x190   : > { %2653 = vmatprep.mubr.bf16.mxu0 %v5190_v61  ;;  %2556 = vmatprep.mubr.bf16.mxu1 %v5236_v17 }
 0x197   : > { %2654 = vmatmul.mubr.bf16.gmra.mrb[80].mxu0 %v5193_v8  ;;  %2557 = vmatmul.mubr.bf16.gmra.mrb[48].mxu1 %v5240_v51 }
 0x198   : > { %2661 = vmatprep.mubr.bf16.mxu0 %v5196_v19  ;;  %2564 = vmatprep.mubr.bf16.mxu1 %v5242_v49 }
 0x19f   : > { %2662 = vmatmul.mubr.bf16.gmra.mrb[84].mxu0 %v5199_v48  ;;  %2565 = vmatmul.mubr.bf16.gmra.mrb[52].mxu1 %v5246_v16 }
 0x1a0   : > { %2669 = vmatprep.mubr.bf16.mxu0 %v5202_v22  ;;  %2572 = vmatprep.mubr.bf16.mxu1 %v5248_v5 }
 0x1a7   : > { %2670 = vmatmul.mubr.bf16.gmra.mrb[88].mxu0 %v5205_v2  ;;  %2573 = vmatmul.mubr.bf16.gmra.mrb[56].mxu1 %v5252_v3 }
 0x1a8   : > { %2677 = vmatprep.mubr.bf16.mxu0 %v5208_v4  ;;  %2580 = vmatprep.mubr.bf16.mxu1 %v5254_v60 }
 0x1af   : > { %2678 = vmatmul.mubr.bf16.gmra.mrb[92].mxu0 %v5211_v30  ;;  %2581 = vmatmul.mubr.bf16.gmra.mrb[60].mxu1 %v5258_v45 }
 0x1b0   : > { %2685 = vmatprep.mubr.bf16.mxu0 %v5214_v46 }
 0x1b7   : > { %2686 = vmatmul.mubr.bf16.gmra.mrb[96].mxu0 %v5217_v39 }
 0x1b8   : > { %2693 = vmatprep.mubr.bf16.mxu0 %v5220_v13 }
 0x1bf   : > { %2694 = vmatmul.mubr.bf16.gmra.mrb[100].mxu0 %v5223_v20 }
 0x1c0   : > { %2701 = vmatprep.mubr.bf16.mxu0 %v5226_v44 }
 0x1c7   : > { %2702 = vmatmul.mubr.bf16.gmra.mrb[104].mxu0 %v5229_v55 }
 0x1c8   : > { %2709 = vmatprep.mubr.bf16.mxu0 %v5232_v0 }
 0x1cf   : > { %2710 = vmatmul.mubr.bf16.gmra.mrb[108].mxu0 %v5235_v37 }
 0x1d0   : > { %2717 = vmatprep.mubr.bf16.mxu0 %v5238_v56 }
 0x1d7   : > { %2718 = vmatmul.mubr.bf16.gmra.mrb[112].mxu0 %v5241_v10 }
 0x1d8   : > { %2725 = vmatprep.mubr.bf16.mxu0 %v5244_v9 }
 0x1df   : > { %2726 = vmatmul.mubr.bf16.gmra.mrb[116].mxu0 %v5247_v53 }
 0x1e0   : > { %2733 = vmatprep.mubr.bf16.mxu0 %v5250_v29 }
 0x1e7   : > { %2734 = vmatmul.mubr.bf16.gmra.mrb[120].mxu0 %v5253_v1 }
 0x1e8   : > { %2741 = vmatprep.mubr.bf16.mxu0 %v5256_v41 }
 0x1ef   : > { %2742 = vmatmul.mubr.bf16.gmra.mrb[124].mxu0 %v5259_v42 }
 0x20a   : > { %v4702_v24 = vpop.f32.mrb[0].mxu1 }
 0x20b   : > { %v4703_v62 = vpop.f32.mrb[1].mxu1 }
 0x20c   : > { %v4704_v43 = vadd.f32 %v4703_v62, %v4702_v24  ;;  %v4705_v40 = vpop.f32.mrb[2].mxu1  ;;  %v5262_v24 = vld [vmem:[%s7340_s5 + $0x4] ss:$8 sps:$4 sm:$0xff]  }
 0x20d   : > { %v4706_v63 = vpop.f32.mrb[3].mxu1  ;;  %3726 = vmatprep.mubr.bf16.mxu0 %v5262_v24 }
 0x20e   : > { %v4707_v18 = vadd.f32 %v4706_v63, %v4705_v40 }
 0x212   : > { %v4708_v59 = vpop.f32.mrb[4].mxu1 }
 0x213   : > { %v4709_v35 = vpop.f32.mrb[5].mxu1 }
 0x214   : > { %v6535_v38 = vadd.f32 %v4709_v35, %v4708_v59  ;;  %v4711_v52 = vpop.f32.mrb[6].mxu1  ;;  %v5265_v59 = vld [vmem:[%s7340_s5 + $0x14] ss:$8 sps:$4 sm:$0xff]  }
 0x215   : > { %v4712_v25 = vpop.f32.mrb[7].mxu1  ;;  %3734 = vmatprep.mubr.bf16.mxu1 %v5265_v59 }
 0x216   : > { %v6537_v7 = vadd.f32 %v4712_v25, %v4711_v52 }
 0x21a   : > { %v4714_v6 = vpop.f32.mrb[8].mxu1 }
 0x21b   : > { %v4715_v54 = vpop.f32.mrb[9].mxu1 }
 0x21c   : > { %v6539_v15 = vadd.f32 %v4715_v54, %v4714_v6  ;;  %v4717_v36 = vpop.f32.mrb[10].mxu1 }
 0x21d   : > { %v4718_v33 = vpop.f32.mrb[11].mxu1 }
 0x21e   : > { %v6541_v26 = vadd.f32 %v4718_v33, %v4717_v36 }
 0x222   : > { %v4720_v11 = vpop.f32.mrb[12].mxu1 }
 0x223   : > { %v4721_v27 = vpop.f32.mrb[13].mxu1 }
 0x224   : > { %v6543_v34 = vadd.f32 %v4721_v27, %v4720_v11  ;;  %v4723_v23 = vpop.f32.mrb[14].mxu1 }
 0x225   : > { %v4724_v31 = vpop.f32.mrb[15].mxu1 }
 0x226   : > { %v6545_v50 = vadd.f32 %v4724_v31, %v4723_v23  ;;  %v6589_v31 = vpop.permute.xlu1 %3004 }
 0x22a   : > { %v4726_v58 = vpop.f32.mrb[16].mxu1 }
 0x22b   : > { %v4727_v57 = vpop.f32.mrb[17].mxu1 }
 0x22c   : > { %v6547_v47 = vadd.f32 %v4727_v57, %v4726_v58  ;;  %v4729_v32 = vpop.f32.mrb[18].mxu1 }
 0x22d   : > { %v4730_v28 = vpop.f32.mrb[19].mxu1 }
 0x22e   : > { %v6549_v14 = vadd.f32 %v4730_v28, %v4729_v32 }
 0x232   : > { %v4732_v61 = vpop.f32.mrb[20].mxu1 }
 0x233   : > { %v4733_v17 = vpop.f32.mrb[21].mxu1 }
 0x234   : > { %v6551_v8 = vadd.f32 %v4733_v17, %v4732_v61  ;;  %v4735_v51 = vpop.f32.mrb[22].mxu1 }
 0x235   : > { %v4736_v19 = vpop.f32.mrb[23].mxu1 }
 0x236   : > { %v6553_v49 = vadd.f32 %v4736_v19, %v4735_v51 }
 0x23a   : > { %v4738_v48 = vpop.f32.mrb[24].mxu1 }
 0x23b   : > { %v4739_v16 = vpop.f32.mrb[25].mxu1 }
 0x23c   : > { %v6555_v22 = vadd.f32 %v4739_v16, %v4738_v48  ;;  %v4741_v5 = vpop.f32.mrb[26].mxu1 }
 0x23d   : > { %v4742_v2 = vpop.f32.mrb[27].mxu1 }
 0x23e   : > { %v6557_v3 = vadd.f32 %v4742_v2, %v4741_v5 }
 0x242   : > { %v4744_v4 = vpop.f32.mrb[28].mxu1 }
 0x243   : > { %v4745_v60 = vpop.f32.mrb[29].mxu1 }
 0x244   : > { %v6559_v30 = vadd.f32 %v4745_v60, %v4744_v4  ;;  %v4747_v45 = vpop.f32.mrb[30].mxu1  ;;  %v6603_v60 = vpop.permute.xlu0 %2992 }
 0x245   : > { %v4748_v46 = vpop.f32.mrb[31].mxu1 }
 0x246   : > { %v6561_v39 = vadd.f32 %v4748_v46, %v4747_v45  ;;  %v6605_v45 = vpop.permute.xlu1 %2812 }
 0x24a   : > { %v4814_v13 = vpop.f32.mrb[64].mxu0  ;;  %v4750_v20 = vpop.f32.mrb[32].mxu1 }
 0x24b   : > { %v4815_v44 = vpop.f32.mrb[65].mxu0  ;;  %v4751_v55 = vpop.f32.mrb[33].mxu1 }
 0x24c   : > { %v4816_v0 = vadd.f32 %v4815_v44, %v4814_v13  ;;  %v4817_v37 = vpop.f32.mrb[66].mxu0  ;;  %v6563_v56 = vadd.f32 %v4751_v55, %v4750_v20  ;;  %v4753_v10 = vpop.f32.mrb[34].mxu1 }
 0x24d   : > { %v4818_v9 = vpop.f32.mrb[67].mxu0  ;;  %v4754_v53 = vpop.f32.mrb[35].mxu1 }
 0x24e   : > { %v6565_v29 = vadd.f32 %v4816_v0, %v4704_v43  ;;  %v4819_v1 = vadd.f32 %v4818_v9, %v4817_v37  ;;  %v6567_v41 = vadd.f32 %v4754_v53, %v4753_v10  ;;  %v6621_v59 = vpop.permute.xlu1 %3028 }
 0x250   : > { %v6569_v42 = vadd.f32 %v4819_v1, %v4707_v18 }
 0x252   : > { %v2750_v62 = vpack.c.bf16 %v6569_v42, %v6565_v29  ;;  %v4820_v40 = vpop.f32.mrb[68].mxu0  ;;  %v4756_v63 = vpop.f32.mrb[36].mxu1 }
 0x253   : > { %v4821_v43 = vpop.f32.mrb[69].mxu0  ;;  %v4757_v35 = vpop.f32.mrb[37].mxu1 }
 0x254   : > { %v4822_v52 = vadd.f32 %v4821_v43, %v4820_v40  ;;  %v4823_v25 = vpop.f32.mrb[70].mxu0  ;;  %v6579_v18 = vadd.f32 %v4757_v35, %v4756_v63  ;;  %v4759_v6 = vpop.f32.mrb[38].mxu1 }
 0x255   : > { %v4824_v54 = vpop.f32.mrb[71].mxu0  ;;  %v4760_v36 = vpop.f32.mrb[39].mxu1 }
 0x256   : > { %v6582_v33 = vadd.f32 %v4822_v52, %v6535_v38  ;;  %v4825_v11 = vadd.f32 %v4824_v54, %v4823_v25  ;;  %v6584_v27 = vadd.f32 %v4760_v36, %v4759_v6  ;;  %v6619_v63 = vpop.permute.xlu0 %2800 }
 0x258   : > { %v6587_v23 = vadd.f32 %v4825_v11, %v6537_v7 }
 0x25a   : > { %v4826_v57 = vpop.f32.mrb[72].mxu0  ;;  %v4762_v32 = vpop.f32.mrb[40].mxu1 }
 0x25b   : > { %v4827_v28 = vpop.f32.mrb[73].mxu0  ;;  %v4763_v61 = vpop.f32.mrb[41].mxu1 }
 0x25c   : > { %v4828_v17 = vadd.f32 %v4827_v28, %v4826_v57  ;;  %v4829_v51 = vpop.f32.mrb[74].mxu0  ;;  %v6593_v19 = vadd.f32 %v4763_v61, %v4762_v32  ;;  %v4765_v38 = vpop.f32.mrb[42].mxu1 }
 0x25d   : > { %v4830_v48 = vpop.f32.mrb[75].mxu0  ;;  %v4766_v16 = vpop.f32.mrb[43].mxu1 }
 0x25e   : > { %v6596_v5 = vadd.f32 %v4828_v17, %v6539_v15  ;;  %v4831_v7 = vadd.f32 %v4830_v48, %v4829_v51  ;;  %v6598_v2 = vadd.f32 %v4766_v16, %v4765_v38  ;;  %v6635_v51 = vpop.permute.xlu0 %3016  ;;  %v6637_v38 = vpop.permute.xlu1 %2836 }
 0x260   : > { %v6601_v4 = vadd.f32 %v4831_v7, %v6541_v26 }
 0x262   : > { %v4832_v13 = vpop.f32.mrb[76].mxu0  ;;  %v4768_v20 = vpop.f32.mrb[44].mxu1 }
 0x263   : > { %v4833_v44 = vpop.f32.mrb[77].mxu0  ;;  %v4769_v55 = vpop.f32.mrb[45].mxu1 }
 0x264   : > { %v4834_v0 = vadd.f32 %v4833_v44, %v4832_v13  ;;  %v4835_v15 = vpop.f32.mrb[78].mxu0  ;;  %v6609_v37 = vadd.f32 %v4769_v55, %v4768_v20  ;;  %v4771_v10 = vpop.f32.mrb[46].mxu1 }
 0x265   : > { %v4836_v9 = vpop.f32.mrb[79].mxu0  ;;  %v4772_v53 = vpop.f32.mrb[47].mxu1 }
 0x266   : > { %v6612_v26 = vadd.f32 %v4834_v0, %v6543_v34  ;;  %v4837_v1 = vadd.f32 %v4836_v9, %v4835_v15  ;;  %v6614_v24 = vadd.f32 %v4772_v53, %v4771_v10 }
 0x268   : > { %v6617_v40 = vadd.f32 %v4837_v1, %v6545_v50 }
 0x26a   : > { %v4838_v35 = vpop.f32.mrb[80].mxu0  ;;  %v4774_v52 = vpop.f32.mrb[48].mxu1 }
 0x26b   : > { %v4839_v25 = vpop.f32.mrb[81].mxu0  ;;  %v4775_v6 = vpop.f32.mrb[49].mxu1 }
 0x26c   : > { %v4840_v54 = vadd.f32 %v4839_v25, %v4838_v35  ;;  %v4841_v34 = vpop.f32.mrb[82].mxu0  ;;  %v6625_v36 = vadd.f32 %v4775_v6, %v4774_v52  ;;  %v4777_v11 = vpop.f32.mrb[50].mxu1 }
 0x26d   : > { %v4842_v57 = vpop.f32.mrb[83].mxu0  ;;  %v4778_v32 = vpop.f32.mrb[51].mxu1 }
 0x26e   : > { %v6628_v50 = vadd.f32 %v4840_v54, %v6547_v47  ;;  %v4843_v28 = vadd.f32 %v4842_v57, %v4841_v34  ;;  %v6630_v61 = vadd.f32 %v4778_v32, %v4777_v11  ;;  %v6651_v35 = vpop.permute.xlu0 %2824  ;;  %v6653_v52 = vpop.permute.xlu1 %3052 }
 0x270   : > { %v6633_v17 = vadd.f32 %v4843_v28, %v6549_v14 }
 0x272   : > { %v4844_v16 = vpop.f32.mrb[84].mxu0  ;;  %v4780_v7 = vpop.f32.mrb[52].mxu1 }
 0x273   : > { %v4845_v13 = vpop.f32.mrb[85].mxu0  ;;  %v4781_v20 = vpop.f32.mrb[53].mxu1 }
 0x274   : > { %v4846_v44 = vadd.f32 %v4845_v13, %v4844_v16  ;;  %v4847_v47 = vpop.f32.mrb[86].mxu0  ;;  %v6641_v55 = vadd.f32 %v4781_v20, %v4780_v7  ;;  %v4783_v0 = vpop.f32.mrb[54].mxu1 }
 0x275   : > { %v4848_v15 = vpop.f32.mrb[87].mxu0  ;;  %v4784_v10 = vpop.f32.mrb[55].mxu1 }
 0x276   : > { %v6644_v14 = vadd.f32 %v4846_v44, %v6551_v8  ;;  %v4849_v9 = vadd.f32 %v4848_v15, %v4847_v47  ;;  %v6646_v53 = vadd.f32 %v4784_v10, %v4783_v0  ;;  %v6664_v44 = vpop.permute.xlu0 %3040  ;;  %v6669_v0 = vpop.permute.xlu1 %2860 }
 0x278   : > { %v6649_v1 = vadd.f32 %v4849_v9, %v6553_v49 }
 0x27a   : > { %v4850_v6 = vpop.f32.mrb[88].mxu0  ;;  %v4786_v54 = vpop.f32.mrb[56].mxu1 }
 0x27b   : > { %v4851_v34 = vpop.f32.mrb[89].mxu0  ;;  %v4787_v11 = vpop.f32.mrb[57].mxu1 }
 0x27c   : > { %v4852_v57 = vadd.f32 %v4851_v34, %v4850_v6  ;;  %v4853_v8 = vpop.f32.mrb[90].mxu0  ;;  %v6657_v32 = vadd.f32 %v4787_v11, %v4786_v54  ;;  %v4789_v28 = vpop.f32.mrb[58].mxu1 }
 0x27d   : > { %v4854_v16 = vpop.f32.mrb[91].mxu0  ;;  %v4790_v7 = vpop.f32.mrb[59].mxu1 }
 0x27e   : > { %v6660_v49 = vadd.f32 %v4852_v57, %v6555_v22  ;;  %v4855_v13 = vadd.f32 %v4854_v16, %v4853_v8  ;;  %v6662_v20 = vadd.f32 %v4790_v7, %v4789_v28  ;;  %v6675_v16 = vpop.permute.xlu0 %2848 }
 0x280   : > { %v6667_v47 = vadd.f32 %v4855_v13, %v6557_v3 }
 0x282   : > { %v4856_v10 = vpop.f32.mrb[92].mxu0  ;;  %v4792_v9 = vpop.f32.mrb[60].mxu1 }
 0x283   : > { %v4857_v6 = vpop.f32.mrb[93].mxu0  ;;  %v4793_v54 = vpop.f32.mrb[61].mxu1 }
 0x284   : > { %v4858_v34 = vadd.f32 %v4857_v6, %v4856_v10  ;;  %v4859_v22 = vpop.f32.mrb[94].mxu0  ;;  %v6673_v11 = vadd.f32 %v4793_v54, %v4792_v9  ;;  %v4795_v57 = vpop.f32.mrb[62].mxu1 }
 0x285   : > { %v4860_v8 = vpop.f32.mrb[95].mxu0  ;;  %v4796_v28 = vpop.f32.mrb[63].mxu1 }
 0x286   : > { %v6678_v3 = vadd.f32 %v4858_v34, %v6559_v30  ;;  %v4861_v7 = vadd.f32 %v4860_v8, %v4859_v22  ;;  %v6680_v13 = vadd.f32 %v4796_v28, %v4795_v57  ;;  %v6687_v9 = vpop.permute.xlu1 %3076  ;;  %v6689_v25 = vpop.permute.xlu0 %3064  ;;  %v2821_v30 = vrot.slane %v6605_v45, %v5869_v12 }
 0x287   : > { %v2809_v34 = vrot.slane %v6619_v63, %v5869_v12  ;;  %v3001_v57 = vrot.slane %v6603_v60, %v5869_v12 }
 0x288   : > { %7394 = vst [vmem:[#allocation19_spill] sm:$0xff] %v6678_v3  ;;  %v6683_v15 = vadd.f32 %v4861_v7, %v6561_v39  ;;  %v3013_v39 = vrot.slane %v6589_v31, %v5869_v12 }
 0x28a   : > { %7395 = vst [vmem:[#allocation4_spill] sm:$0xff] %v6683_v15  ;;  %v4862_v6 = vpop.f32.mrb[96].mxu0  ;;  %v4545_v10 = vcombine.low %v3001_v57, %v3013_v39  ;;  %v6703_v45 = vpop.permute.xlu0 %2872 }
 0x28b   : > { %v4863_v54 = vpop.f32.mrb[97].mxu0 }
 0x28c   : > { %v4864_v48 = vadd.f32 %v4863_v54, %v4862_v6  ;;  %v4865_v43 = vpop.f32.mrb[98].mxu0  ;;  %v4537_v6 = vcombine.low %v2809_v34, %v2821_v30  ;;  %v6701_v54 = vpop.permute.xlu1 %2884  ;;  %v3025_v30 = vrot.slane %v6635_v51, %v5869_v12 }
 0x28d   : > { %v4866_v22 = vpop.f32.mrb[99].mxu0 }
 0x28e   : > { %v2688_v8 = vadd.f32 %v4864_v48, %v6563_v56  ;;  %v4867_v28 = vadd.f32 %v4866_v22, %v4865_v43  ;;  %v3278_v31 = vadd.bf16 %v4537_v6, %v2750_v62  ;;  %v3037_v56 = vrot.slane %v6621_v59, %v5869_v12  ;;  %v6721_v59 = vpop.permute.xlu0 %3088 }
 0x28f   : > { %v2833_v43 = vrot.slane %v6651_v35, %v5869_v12 }
 0x290   : > { %v2691_v7 = vadd.f32 %v4867_v28, %v6567_v41  ;;  %v2845_v41 = vrot.slane %v6637_v38, %v5869_v12  ;;  %v2857_v28 = vrot.slane %v6675_v16, %v5869_v12 }
 0x292   : > { %v2758_v46 = vpack.c.bf16 %v2691_v7, %v2688_v8  ;;  %v4868_v63 = vpop.f32.mrb[100].mxu0  ;;  %v4538_v35 = vcombine.low %v2833_v43, %v2845_v41  ;;  %v3061_v8 = vrot.slane %v6653_v52, %v5869_v12 }
 0x293   : > { %v4869_v58 = vpop.f32.mrb[101].mxu0 }
 0x294   : > { %v4870_v3 = vadd.f32 %v4869_v58, %v4868_v63  ;;  %v4871_v60 = vpop.f32.mrb[102].mxu0  ;;  %v3286_v15 = vadd.bf16 %v4545_v10, %v2758_v46  ;;  %v6718_v58 = vpop.permute.xlu1 %3100  ;;  %v3294_v46 = vmax.bf16 %v7367_v21, %v3278_v31  ;;  %v4546_v10 = vcombine.low %v3025_v30, %v3037_v56 }
 0x295   : > { %v4872_v48 = vpop.f32.mrb[103].mxu0 }
 0x296   : > { %v2696_v29 = vadd.f32 %v4870_v3, %v6579_v18  ;;  %v4873_v42 = vadd.f32 %v4872_v48, %v4871_v60  ;;  %v3302_v62 = vmax.bf16 %v7367_v21, %v3286_v15  ;;  %v7396_v18 = vpack.c.bf16 %v6587_v23, %v6582_v33  ;;  %v2897_v23 = vpop.permute.xlu0 %2896 }
 0x297   : > { %v3049_v33 = vrot.slane %v6664_v44, %v5869_v12 }
 0x298   : > { %v2699_v38 = vadd.f32 %v4873_v42, %v6584_v27  ;;  %4910 = vmatprep.subr.bf16.mxu0 %v3302_v62  ;;  %5088 = vmatprep.subr.bf16.mxu1 %v3302_v62  ;;  %v3279_v15 = vadd.bf16 %v4538_v35, %v7396_v18  ;;  %v2869_v27 = vrot.slane %v6669_v0, %v5869_v12  ;;  %v6733_v7 = vpop.permute.xlu1 %2908 }
 0x299   : > { %4911 = vmatpush3.bf16.msra.mxu0 %v3294_v46  ;;  %5096 = vmatpush3.bf16.msra.mxu1 %v3294_v46  ;;  %v4547_v16 = vcombine.low %v3049_v33, %v3061_v8  ;;  %v3085_v46 = vrot.slane %v6687_v9, %v5869_v12  ;;  %v2881_v35 = vrot.slane %v6703_v45, %v5869_v12 }
 0x29a   : > { %v2759_v51 = vpack.c.bf16 %v2699_v38, %v2696_v29  ;;  %v4874_v34 = vpop.f32.mrb[104].mxu0  ;;  %v3295_v52 = vmax.bf16 %v7367_v21, %v3279_v15  ;;  %v4539_v0 = vcombine.low %v2857_v28, %v2869_v27  ;;  %v6746_v29 = vpop.permute.xlu0 %3112  ;;  %v2893_v38 = vrot.slane %v6701_v54, %v5869_v12 }
 0x29b   : > { %v4875_v3 = vpop.f32.mrb[105].mxu0  ;;  %v2905_v33 = vrot.slane %v2897_v23, %v5869_v12 }
 0x29c   : > { %v4876_v22 = vadd.f32 %v4875_v3, %v4874_v34  ;;  %v4877_v39 = vpop.f32.mrb[106].mxu0  ;;  %v3287_v57 = vadd.bf16 %v4546_v10, %v2759_v51  ;;  %v6741_v48 = vpop.permute.xlu1 %3124  ;;  %v4540_v9 = vcombine.low %v2881_v35, %v2893_v38  ;;  %v3121_v38 = vrot.slane %v6746_v29, %v5869_v12 }
 0x29d   : > { %v4878_v6 = vpop.f32.mrb[107].mxu0  ;;  %v7400_v29 = vpack.c.bf16 %v6649_v1, %v6644_v14 }
 0x29e   : > { %v2704_v63 = vadd.f32 %v4876_v22, %v6593_v19  ;;  %v4879_v31 = vadd.f32 %v4878_v6, %v4877_v39  ;;  %v3303_v60 = vmax.bf16 %v7367_v21, %v3287_v57  ;;  %v7397_v19 = vpack.c.bf16 %v6601_v4, %v6596_v5  ;;  %v2921_v3 = vpop.permute.xlu0 %2920 }
 0x29f   : > { %v3073_v5 = vrot.slane %v6689_v25, %v5869_v12  ;;  %v2917_v6 = vrot.slane %v6733_v7, %v5869_v12 }
 0x2a0   : > { %v2707_v56 = vadd.f32 %v4879_v31, %v6598_v2  ;;  %4912 = vmatprep.subr.bf16.mxu0 %v3303_v60  ;;  %5089 = vmatprep.subr.bf16.mxu1 %v3303_v60  ;;  %v3280_v44 = vadd.bf16 %v4539_v0, %v7397_v19  ;;  %v2933_v54 = vpop.permute.xlu1 %2932  ;;  %v3097_v31 = vrot.slane %v6721_v59, %v5869_v12 }
 0x2a1   : > { %4913 = vmatpush3.bf16.msra.mxu0 %v3295_v52  ;;  %5097 = vmatpush3.bf16.msra.mxu1 %v3295_v52  ;;  %v4548_v45 = vcombine.low %v3073_v5, %v3085_v46  ;;  %v4541_v7 = vcombine.low %v2905_v33, %v2917_v6 }
 0x2a2   : > { %v2760_v41 = vpack.c.bf16 %v2707_v56, %v2704_v63  ;;  %v4880_v43 = vpop.f32.mrb[108].mxu0  ;;  %v3296_v18 = vmax.bf16 %v7367_v21, %v3280_v44  ;;  %v3137_v0 = vpop.permute.xlu0 %3136 }
 0x2a3   : > { %v4881_v30 = vpop.f32.mrb[109].mxu0 }
 0x2a4   : > { %v4882_v42 = vadd.f32 %v4881_v30, %v4880_v43  ;;  %v4883_v62 = vpop.f32.mrb[110].mxu0  ;;  %v3288_v2 = vadd.bf16 %v4547_v16, %v2760_v41  ;;  %v3149_v52 = vpop.permute.xlu1 %3148 }
 0x2a5   : > { %v4884_v10 = vpop.f32.mrb[111].mxu0 }
 0x2a6   : > { %v2712_v4 = vadd.f32 %v4882_v42, %v6609_v37  ;;  %v4885_v51 = vadd.f32 %v4884_v10, %v4883_v62  ;;  %v3304_v34 = vmax.bf16 %v7367_v21, %v3288_v2  ;;  %v7398_v37 = vpack.c.bf16 %v6617_v40, %v6612_v26  ;;  %v2945_v35 = vpop.permute.xlu0 %2944 }
 0x2a7   : > { %v3133_v42 = vrot.slane %v6741_v48, %v5869_v12  ;;  %v2929_v62 = vrot.slane %v2921_v3, %v5869_v12 }
 0x2a8   : > { %v2715_v15 = vadd.f32 %v4885_v51, %v6614_v24  ;;  %4914 = vmatprep.subr.bf16.mxu0 %v3304_v34  ;;  %5090 = vmatprep.subr.bf16.mxu1 %v3304_v34  ;;  %v3281_v25 = vadd.bf16 %v4540_v9, %v7398_v37  ;;  %v3109_v24 = vrot.slane %v6718_v58, %v5869_v12  ;;  %v2957_v2 = vpop.permute.xlu1 %2956 }
 0x2a9   : > { %4915 = vmatpush3.bf16.msra.mxu0 %v3296_v18  ;;  %5098 = vmatpush3.bf16.msra.mxu1 %v3296_v18  ;;  %v4550_v51 = vcombine.low %v3121_v38, %v3133_v42  ;;  %v2953_v37 = vrot.slane %v2945_v35, %v5869_v12  ;;  %v7403_v42 = vld [vmem:[#allocation19_spill] sm:$0xff]  ;;  %v5269_v35 = vld [vmem:[%s7340_s5 + $0x34] ss:$8 sps:$4 sm:$0xff]  }
 0x2aa   : > { %v2761_v22 = vpack.c.bf16 %v2715_v15, %v2712_v4  ;;  %v4886_v39 = vpop.f32.mrb[112].mxu0  ;;  %v3297_v56 = vmax.bf16 %v7367_v21, %v3281_v25  ;;  %v4549_v23 = vcombine.low %v3097_v31, %v3109_v24  ;;  %v5266_v38 = vld [vmem:[%s7340_s5 + $0x24] ss:$8 sps:$4 sm:$0xff]  }
 0x2ab   : > { %v4887_v57 = vpop.f32.mrb[113].mxu0 }
 0x2ac   : > { %v4888_v8 = vadd.f32 %v4887_v57, %v4886_v39  ;;  %v4889_v27 = vpop.f32.mrb[114].mxu0  ;;  %v3289_v28 = vadd.bf16 %v4548_v45, %v2761_v22  ;;  %v3173_v15 = vpop.permute.xlu1 %3172  ;;  %v2965_v39 = vrot.slane %v2957_v2, %v5869_v12  ;;  %v3145_v57 = vrot.slane %v3137_v0, %v5869_v12 }
 0x2ad   : > { %v4890_v63 = vpop.f32.mrb[115].mxu0 }
 0x2ae   : > { %v2720_v60 = vadd.f32 %v4888_v8, %v6625_v36  ;;  %v4891_v26 = vadd.f32 %v4890_v63, %v4889_v27  ;;  %v3305_v40 = vmax.bf16 %v7367_v21, %v3289_v28  ;;  %v7399_v36 = vpack.c.bf16 %v6633_v17, %v6628_v50 }
 0x2af   : > { %v4543_v24 = vcombine.low %v2953_v37, %v2965_v39  ;;  %v5298_v39 = vld [vmem:[%s7340_s5 + $0xc0] ss:$8 sps:$4 sm:$0xff]   ;;  %v5299_v37 = vld [vmem:[%s7340_s5 + $0xd4] ss:$8 sps:$4 sm:$0xff]  }
 0x2b0   : > { %v2723_v58 = vadd.f32 %v4891_v26, %v6630_v61  ;;  %4916 = vmatprep.subr.bf16.mxu0 %v3305_v40  ;;  %5091 = vmatprep.subr.bf16.mxu1 %v3305_v40  ;;  %v3282_v59 = vadd.bf16 %v4541_v7, %v7399_v36  ;;  %v2941_v61 = vrot.slane %v2933_v54, %v5869_v12  ;;  %v3161_v54 = vpop.permute.xlu0 %3160  ;;  %v2981_v6 = vpop.permute.xlu1 %2980 }
 0x2b1   : > { %4917 = vmatpush3.bf16.msra.mxu0 %v3297_v56  ;;  %5099 = vmatpush3.bf16.msra.mxu1 %v3297_v56 }
 0x2b2   : > { %v2762_v16 = vpack.c.bf16 %v2723_v58, %v2720_v60  ;;  %v4892_v41 = vpop.f32.mrb[116].mxu0  ;;  %v3298_v5 = vmax.bf16 %v7367_v21, %v3282_v59  ;;  %v4542_v48 = vcombine.low %v2929_v62, %v2941_v61  ;;  %v2989_v58 = vrot.slane %v2981_v6, %v5869_v12 }
 0x2b3   : > { %v4893_v43 = vpop.f32.mrb[117].mxu0 }
 0x2b4   : > { %v4894_v19 = vadd.f32 %v4893_v43, %v4892_v41  ;;  %v4895_v44 = vpop.f32.mrb[118].mxu0  ;;  %v3290_v30 = vadd.bf16 %v4549_v23, %v2762_v16  ;;  %v2969_v63 = vpop.permute.xlu0 %2968  ;;  %v3169_v16 = vrot.slane %v3161_v54, %v5869_v12  ;;  %v5290_v54 = vld [vmem:[%s7340_s5 + $0xa4] ss:$8 sps:$4 sm:$0xff]  }
 0x2b5   : > { %v4896_v46 = vpop.f32.mrb[119].mxu0  ;;  %v2977_v7 = vrot.slane %v2969_v63, %v5869_v12 }
 0x2b6   : > { %v2728_v50 = vadd.f32 %v4894_v19, %v6641_v55  ;;  %v4897_v17 = vadd.f32 %v4896_v46, %v4895_v44  ;;  %v3306_v10 = vmax.bf16 %v7367_v21, %v3290_v30  ;;  %v3283_v55 = vadd.bf16 %v4542_v48, %v7400_v29  ;;  %v7402_v30 = vld [vmem:[#allocation4_spill] sm:$0xff]  ;;  %v5278_v48 = vld [vmem:[%s7340_s5 + $0x64] ss:$8 sps:$4 sm:$0xff]   ;;  %v5286_v29 = vld [vmem:[%s7340_s5 + $0x80] ss:$8 sps:$4 sm:$0xff]  }
 0x2b7   : > { %v4544_v43 = vcombine.low %v2977_v7, %v2989_v58  ;;  %v7404_v61 = vpack.c.bf16 %v7402_v30, %v7403_v42  ;;  %v5263_v46 = vld [vmem:[%s7340_s5 + $0x10] ss:$8 sps:$4 sm:$0xff]  }
 0x2b8   : > { %v2731_v4 = vadd.f32 %v4897_v17, %v6646_v53  ;;  %4918 = vmatprep.subr.bf16.mxu0 %v3306_v10  ;;  %5092 = vmatprep.subr.bf16.mxu1 %v3306_v10  ;;  %v3157_v53 = vrot.slane %v3149_v52, %v5869_v12  ;;  %v3299_v1 = vmax.bf16 %v7367_v21, %v3283_v55  ;;  %v5272_v17 = vld [vmem:[%s7340_s5 + $0x44] ss:$8 sps:$4 sm:$0xff]   ;;  %v5274_v10 = vld [vmem:[%s7340_s5 + $0x40] ss:$8 sps:$4 sm:$0xff]   ;;  %v5287_v55 = vld [vmem:[%s7340_s5 + $0x94] ss:$8 sps:$4 sm:$0xff]  }
 0x2b9   : > { %4919 = vmatpush3.bf16.msra.mxu0 %v3298_v5  ;;  %5100 = vmatpush3.bf16.msra.mxu1 %v3298_v5  ;;  %v5275_v5 = vld [vmem:[%s7340_s5 + $0x54] ss:$8 sps:$4 sm:$0xff]  }
 0x2ba   : > { %v2763_v34 = vpack.c.bf16 %v2731_v4, %v2728_v50  ;;  %v4898_v18 = vpop.f32.mrb[120].mxu0  ;;  %v4551_v33 = vcombine.low %v3145_v57, %v3157_v53  ;;  %v5271_v50 = vld [vmem:[%s7340_s5 + $0x30] ss:$8 sps:$4 sm:$0xff]   ;;  %v5296_v53 = vld [vmem:[%s7340_s5 + $0xc4] ss:$8 sps:$4 sm:$0xff]  }
 0x2bb   : > { %v4899_v9 = vpop.f32.mrb[121].mxu0  ;;  %v5277_v4 = vld [vmem:[%s7340_s5 + $0x50] ss:$8 sps:$4 sm:$0xff]   ;;  %v5302_v57 = vld [vmem:[%s7340_s5 + $0xe4] ss:$8 sps:$4 sm:$0xff]  }
 0x2bc   : > { %v4900_v45 = vadd.f32 %v4899_v9, %v4898_v18  ;;  %v4901_v3 = vpop.f32.mrb[122].mxu0  ;;  %v3291_v22 = vadd.bf16 %v4550_v51, %v2763_v34  ;;  %v5280_v51 = vld [vmem:[%s7340_s5 + $0x60] ss:$8 sps:$4 sm:$0xff]   ;;  %v5281_v34 = vld [vmem:[%s7340_s5 + $0x74] ss:$8 sps:$4 sm:$0xff]  }
 0x2bd   : > { %v4902_v25 = vpop.f32.mrb[123].mxu0  ;;  %v5283_v18 = vld [vmem:[%s7340_s5 + $0x70] ss:$8 sps:$4 sm:$0xff]  }
 0x2be   : > { %v2736_v8 = vadd.f32 %v4900_v45, %v6657_v32  ;;  %v4903_v27 = vadd.f32 %v4902_v25, %v4901_v3  ;;  %v3307_v14 = vmax.bf16 %v7367_v21, %v3291_v22  ;;  %v7401_v32 = vpack.c.bf16 %v6667_v47, %v6660_v49  ;;  %v5289_v9 = vld [vmem:[%s7340_s5 + $0x90] ss:$8 sps:$4 sm:$0xff]   ;;  %v5292_v45 = vld [vmem:[%s7340_s5 + $0xa0] ss:$8 sps:$4 sm:$0xff]   ;;  %v5293_v3 = vld [vmem:[%s7340_s5 + $0xb4] ss:$8 sps:$4 sm:$0xff]  }
 0x2bf   : > { %v5295_v22 = vld [vmem:[%s7340_s5 + $0xb0] ss:$8 sps:$4 sm:$0xff]  }
 0x2c0   : > { %v2739_v28 = vadd.f32 %v4903_v27, %v6662_v20  ;;  %4920 = vmatprep.subr.bf16.mxu0 %v3307_v14  ;;  %5093 = vmatprep.subr.bf16.mxu1 %v3307_v14  ;;  %v3284_v26 = vadd.bf16 %v4543_v24, %v7401_v32  ;;  %v3181_v20 = vrot.slane %v3173_v15, %v5869_v12  ;;  %v5284_v15 = vld [vmem:[%s7340_s5 + $0x84] ss:$8 sps:$4 sm:$0xff]   ;;  %v5301_v25 = vld [vmem:[%s7340_s5 + $0xd0] ss:$8 sps:$4 sm:$0xff]   ;;  %v5305_v27 = vld [vmem:[%s7340_s5 + $0xf4] ss:$8 sps:$4 sm:$0xff]  }
 0x2c1   : > { %4921 = vmatpush3.bf16.msra.mxu0 %v3299_v1  ;;  %5101 = vmatpush3.bf16.msra.mxu1 %v3299_v1  ;;  %v3285_v12 = vadd.bf16 %v4544_v43, %v7404_v61  ;;  %v5307_v14 = vld [vmem:[%s7340_s5 + $0xf0] ss:$8 sps:$4 sm:$0xff]   ;;  %v3382_v1 = vpop.permute.xlu1 %3381 }
 0x2c2   : > { %v2764_v31 = vpack.c.bf16 %v2739_v28, %v2736_v8  ;;  %v4904_v60 = vpop.f32.mrb[124].mxu0  ;;  %v3300_v49 = vmax.bf16 %v7367_v21, %v3284_v26  ;;  %v4552_v19 = vcombine.low %v3169_v16, %v3181_v20  ;;  %v5304_v8 = vld [vmem:[%s7340_s5 + $0xe0] ss:$8 sps:$4 sm:$0xff]   ;;  %v3377_v28 = vpop.permute.xlu0 %3376 }
 0x2c3   : > { %v4905_v40 = vpop.f32.mrb[125].mxu0  ;;  %v3301_v2 = vmax.bf16 %v7367_v21, %v3285_v12 }
 0x2c4   : > { %v4906_v52 = vadd.f32 %v4905_v40, %v4904_v60  ;;  %v4907_v56 = vpop.f32.mrb[126].mxu0  ;;  %v3292_v0 = vadd.bf16 %v4551_v33, %v2764_v31 }
 0x2c5   : > { %v4908_v23 = vpop.f32.mrb[127].mxu0  ;;  %v3392_v58 = vpop.permute.xlu1 %3391 }
 0x2c6   : > { %v2744_v41 = vadd.f32 %v4906_v52, %v6673_v11  ;;  %v4909_v36 = vadd.f32 %v4908_v23, %v4907_v56  ;;  %v3308_v59 = vmax.bf16 %v7367_v21, %v3292_v0  ;;  %v3387_v20 = vpop.permute.xlu0 %3386 }
 0x2c8   : > { %v2747_v47 = vadd.f32 %v4909_v36, %v6680_v13  ;;  %4922 = vmatprep.subr.bf16.mxu0 %v3308_v59  ;;  %5094 = vmatprep.subr.bf16.mxu1 %v3308_v59  ;;  %v5260_v13 = vld [vmem:[%s7340_s5] ss:$8 sps:$4 sm:$0xff]  }
 0x2c9   : > { %4923 = vmatpush3.bf16.msra.mxu0 %v3300_v49  ;;  %5102 = vmatpush3.bf16.msra.mxu1 %v3300_v49 }
 0x2ca   : > { %v2765_v44 = vpack.c.bf16 %v2747_v47, %v2744_v41  ;;  %v3397_v59 = vpop.permute.xlu0 %3396 }
 0x2cc   : > { %v3293_v62 = vadd.bf16 %v4552_v19, %v2765_v44  ;;  %v3402_v44 = vpop.permute.xlu1 %3401 }
 0x2ce   : > { %v3309_v11 = vmax.bf16 %v7367_v21, %v3293_v62  ;;  %v5268_v21 = vld [vmem:[%s7340_s5 + $0x20] ss:$8 sps:$4 sm:$0xff]  }
 0x2d0   : > { %4924 = vmatprep.subr.bf16.mxu0 %v3309_v11  ;;  %5095 = vmatprep.subr.bf16.mxu1 %v3309_v11 }
 0x2d1   : > { %4925 = vmatpush3.bf16.msra.mxu0 %v3301_v2  ;;  %5103 = vmatpush3.bf16.msra.mxu1 %v3301_v2 }
 0x2d4   : > { %3727 = vmatmul.mubr.bf16.vlgmr.msra.gmra.mrb[128].mxu0 %v5260_v13  ;;  %3735 = vmatmul.mubr.bf16.vlgmr.msra.gmra.mrb[64].mxu1 %v5263_v46 }
 0x2d5   : > { %3742 = vmatprep.mubr.bf16.mxu1 %v5266_v38 }
 0x2dc   : > { %3743 = vmatmul.mubr.bf16.gmra.mrb[68].mxu1 %v5268_v21 }
 0x2dd   : > { %3750 = vmatprep.mubr.bf16.mxu1 %v5269_v35 }
 0x2e4   : > { %3751 = vmatmul.mubr.bf16.gmra.mrb[72].mxu1 %v5271_v50  ;;  %v3407_v50 = vpop.permute.xlu0 %3406 }
 0x2e5   : > { %3758 = vmatprep.mubr.bf16.mxu1 %v5272_v17 }
 0x2ec   : > { %3759 = vmatmul.mubr.bf16.gmra.mrb[76].mxu1 %v5274_v10 }
 0x2ed   : > { %3766 = vmatprep.mubr.bf16.mxu1 %v5275_v5 }
 0x2f4   : > { %3767 = vmatmul.mubr.bf16.gmra.mrb[80].mxu1 %v5277_v4 }
 0x2f5   : > { %3774 = vmatprep.mubr.bf16.mxu1 %v5278_v48  ;;  %v3412_v48 = vpop.permute.xlu1 %3411 }
 0x2fc   : > { %3775 = vmatmul.mubr.bf16.gmra.mrb[84].mxu1 %v5280_v51 }
 0x2fd   : > { %3782 = vmatprep.mubr.bf16.mxu1 %v5281_v34 }
 0x304   : > { %3783 = vmatmul.mubr.bf16.gmra.mrb[88].mxu1 %v5283_v18 }
 0x305   : > { %3790 = vmatprep.mubr.bf16.mxu1 %v5284_v15 }
 0x30c   : > { %3791 = vmatmul.mubr.bf16.gmra.mrb[92].mxu1 %v5286_v29 }
 0x30d   : > { %3798 = vmatprep.mubr.bf16.mxu1 %v5287_v55 }
 0x314   : > { %3799 = vmatmul.mubr.bf16.gmra.mrb[96].mxu1 %v5289_v9 }
 0x315   : > { %3806 = vmatprep.mubr.bf16.mxu1 %v5290_v54 }
 0x31c   : > { %3807 = vmatmul.mubr.bf16.gmra.mrb[100].mxu1 %v5292_v45 }
 0x31d   : > { %3814 = vmatprep.mubr.bf16.mxu1 %v5293_v3 }
 0x324   : > { %3815 = vmatmul.mubr.bf16.gmra.mrb[104].mxu1 %v5295_v22 }
 0x325   : > { %3822 = vmatprep.mubr.bf16.mxu1 %v5296_v53  ;;  %v3417_v53 = vpop.permute.xlu0 %3416 }
 0x32c   : > { %3823 = vmatmul.mubr.bf16.gmra.mrb[108].mxu1 %v5298_v39 }
 0x32d   : > { %3830 = vmatprep.mubr.bf16.mxu1 %v5299_v37 }
 0x334   : > { %3831 = vmatmul.mubr.bf16.gmra.mrb[112].mxu1 %v5301_v25 }
 0x335   : > { %3838 = vmatprep.mubr.bf16.mxu1 %v5302_v57  ;;  %v3422_v57 = vpop.permute.xlu1 %3421 }
 0x33c   : > { %3839 = vmatmul.mubr.bf16.gmra.mrb[116].mxu1 %v5304_v8 }
 0x33d   : > { %3846 = vmatprep.mubr.bf16.mxu1 %v5305_v27 }
 0x344   : > { %3847 = vmatmul.mubr.bf16.gmra.mrb[120].mxu1 %v5307_v14 }
 0x3a7   : > { %v4926_v24 = vpop.f32.mrb[128].mxu0  ;;  %v4932_v6 = vpop.f32.mrb[64].mxu1 }
 0x3a8   : > { %v4927_v33 = vpop.f32.mrb[129].mxu0  ;;  %v4933_v63 = vpop.f32.mrb[65].mxu1 }
 0x3a9   : > { %v4928_v31 = vadd.f32 %v4927_v33, %v4926_v24  ;;  %v4934_v60 = vadd.f32 %v4933_v63, %v4932_v6  ;;  %v4929_v32 = vpop.f32.mrb[130].mxu0  ;;  %v4935_v26 = vpop.f32.mrb[66].mxu1 }
 0x3aa   : > { %v4930_v40 = vpop.f32.mrb[131].mxu0  ;;  %v4936_v52 = vpop.f32.mrb[67].mxu1 }
 0x3ab   : > { %v4931_v56 = vadd.f32 %v4930_v40, %v4929_v32  ;;  %v4937_v0 = vadd.f32 %v4936_v52, %v4935_v26  ;;  %v6904_v16 = vadd.f32 %v4928_v31, %v3377_v28  ;;  %v6920_v38 = vadd.f32 %v4934_v60, %v3387_v20  ;;  %v3427_v31 = vpop.permute.xlu0 %3426  ;;  %v3432_v40 = vpop.permute.xlu1 %3431 }
 0x3ad   : > { %v6906_v47 = vadd.f32 %v4931_v56, %v3382_v1  ;;  %v3856_v30 = vsel %vm3855_vm1, %v6904_v16, -inf  ;;  %v6922_v10 = vadd.f32 %v4937_v0, %v3392_v58  ;;  %v3858_v51 = vsel %vm3855_vm1, %v6920_v38, -inf }
 0x3af   : > { %v4938_v7 = vpop.f32.mrb[68].mxu1  ;;  %v3857_v62 = vsel %vm3855_vm1, %v6906_v47, -inf  ;;  %v3859_v29 = vsel %vm3855_vm1, %v6922_v10, -inf }
 0x3b0   : > { %v4939_v23 = vpop.f32.mrb[69].mxu1 }
 0x3b1   : > { %v4940_v41 = vadd.f32 %v4939_v23, %v4938_v7  ;;  %v4941_v36 = vpop.f32.mrb[70].mxu1 }
 0x3b2   : > { %v4942_v49 = vpop.f32.mrb[71].mxu1 }
 0x3b3   : > { %v6908_v43 = vadd.f32 %v4940_v41, %v3397_v59  ;;  %v4943_v19 = vadd.f32 %v4942_v49, %v4941_v36  ;;  %v3437_v59 = vpop.permute.xlu0 %3436 }
 0x3b5   : > { %v3860_v42 = vsel %vm3855_vm1, %v6908_v43, -inf  ;;  %v6914_v61 = vadd.f32 %v4943_v19, %v3402_v44 }
 0x3b6   : > { %v3861_v12 = vmax.f32 %v3856_v30, %v3860_v42  ;;  %v3442_v30 = vpop.permute.xlu1 %3441 }
 0x3b7   : > { %v3862_v11 = vsel %vm3855_vm1, %v6914_v61, -inf  ;;  %v4944_v2 = vpop.f32.mrb[72].mxu1 }
 0x3b8   : > { %v3863_v13 = vmax.f32 %v3857_v62, %v3862_v11  ;;  %v4945_v46 = vpop.f32.mrb[73].mxu1 }
 0x3b9   : > { %v4946_v21 = vadd.f32 %v4945_v46, %v4944_v2  ;;  %v4947_v35 = vpop.f32.mrb[74].mxu1 }
 0x3ba   : > { %v4948_v17 = vpop.f32.mrb[75].mxu1 }
 0x3bb   : > { %v6924_v5 = vadd.f32 %v4946_v21, %v3407_v50  ;;  %v4949_v4 = vadd.f32 %v4948_v17, %v4947_v35  ;;  %v3447_v50 = vpop.permute.xlu0 %3446 }
 0x3bd   : > { %v3864_v34 = vsel %vm3855_vm1, %v6924_v5, -inf  ;;  %v6930_v18 = vadd.f32 %v4949_v4, %v3412_v48 }
 0x3be   : > { %v3865_v15 = vmax.f32 %v3858_v51, %v3864_v34  ;;  %v3452_v51 = vpop.permute.xlu1 %3451 }
 0x3bf   : > { %v3866_v55 = vsel %vm3855_vm1, %v6930_v18, -inf  ;;  %v4950_v9 = vpop.f32.mrb[76].mxu1 }
 0x3c0   : > { %v3867_v54 = vmax.f32 %v3859_v29, %v3866_v55  ;;  %v4951_v45 = vpop.f32.mrb[77].mxu1 }
 0x3c1   : > { %v4952_v3 = vadd.f32 %v4951_v45, %v4950_v9  ;;  %v4953_v22 = vpop.f32.mrb[78].mxu1 }
 0x3c2   : > { %v4954_v39 = vpop.f32.mrb[79].mxu1 }
 0x3c3   : > { %v6936_v37 = vadd.f32 %v4952_v3, %v3417_v53  ;;  %v4955_v25 = vadd.f32 %v4954_v39, %v4953_v22  ;;  %v3457_v53 = vpop.permute.xlu0 %3456 }
 0x3c5   : > { %v3868_v8 = vsel %vm3855_vm1, %v6936_v37, -inf  ;;  %v6940_v27 = vadd.f32 %v4955_v25, %v3422_v57 }
 0x3c6   : > { %v3869_v14 = vmax.f32 %v3861_v12, %v3868_v8  ;;  %v3462_v8 = vpop.permute.xlu1 %3461 }
 0x3c7   : > { %v3870_v1 = vsel %vm3855_vm1, %v6940_v27, -inf  ;;  %v4956_v28 = vpop.f32.mrb[80].mxu1 }
 0x3c8   : > { %v3871_v24 = vmax.f32 %v3863_v13, %v3870_v1  ;;  %v4957_v6 = vpop.f32.mrb[81].mxu1 }
 0x3c9   : > { %v4958_v33 = vadd.f32 %v4957_v6, %v4956_v28  ;;  %v4959_v63 = vpop.f32.mrb[82].mxu1 }
 0x3ca   : > { %v4960_v60 = vpop.f32.mrb[83].mxu1 }
 0x3cb   : > { %v6944_v32 = vadd.f32 %v4958_v33, %v3427_v31  ;;  %v4961_v26 = vadd.f32 %v4960_v60, %v4959_v63 }
 0x3cd   : > { %v3872_v52 = vsel %vm3855_vm1, %v6944_v32, -inf  ;;  %v6948_v56 = vadd.f32 %v4961_v26, %v3432_v40  ;;  %v3467_v26 = vpop.permute.xlu0 %3466 }
 0x3ce   : > { %v3873_v0 = vmax.f32 %v3865_v15, %v3872_v52 }
 0x3cf   : > { %v3874_v20 = vsel %vm3855_vm1, %v6948_v56, -inf  ;;  %v4962_v58 = vpop.f32.mrb[84].mxu1 }
 0x3d0   : > { %v3875_v7 = vmax.f32 %v3867_v54, %v3874_v20  ;;  %v4963_v23 = vpop.f32.mrb[85].mxu1  ;;  %v3472_v20 = vpop.permute.xlu1 %3471 }
 0x3d1   : > { %v4964_v41 = vadd.f32 %v4963_v23, %v4962_v58  ;;  %v4965_v36 = vpop.f32.mrb[86].mxu1 }
 0x3d2   : > { %v4966_v49 = vpop.f32.mrb[87].mxu1 }
 0x3d3   : > { %v6952_v19 = vadd.f32 %v4964_v41, %v3437_v59  ;;  %v4967_v44 = vadd.f32 %v4966_v49, %v4965_v36 }
 0x3d5   : > { %v3876_v42 = vsel %vm3855_vm1, %v6952_v19, -inf  ;;  %v6956_v12 = vadd.f32 %v4967_v44, %v3442_v30 }
 0x3d6   : > { %v3877_v62 = vmax.f32 %v3869_v14, %v3876_v42  ;;  %v3477_v42 = vpop.permute.xlu0 %3476 }
 0x3d7   : > { %v3878_v11 = vsel %vm3855_vm1, %v6956_v12, -inf  ;;  %v4968_v2 = vpop.f32.mrb[88].mxu1 }
 0x3d8   : > { %v3879_v13 = vmax.f32 %v3871_v24, %v3878_v11  ;;  %v4969_v46 = vpop.f32.mrb[89].mxu1 }
 0x3d9   : > { %v4970_v21 = vadd.f32 %v4969_v46, %v4968_v2  ;;  %v4971_v35 = vpop.f32.mrb[90].mxu1 }
 0x3da   : > { %v4972_v17 = vpop.f32.mrb[91].mxu1 }
 0x3db   : > { %v6960_v4 = vadd.f32 %v4970_v21, %v3447_v50  ;;  %v4973_v48 = vadd.f32 %v4972_v17, %v4971_v35 }
 0x3dd   : > { %v3880_v34 = vsel %vm3855_vm1, %v6960_v4, -inf  ;;  %v6964_v15 = vadd.f32 %v4973_v48, %v3452_v51 }
 0x3de   : > { %v3881_v29 = vmax.f32 %v3873_v0, %v3880_v34 }
 0x3df   : > { %v3882_v55 = vsel %vm3855_vm1, %v6964_v15, -inf  ;;  %v4974_v9 = vpop.f32.mrb[92].mxu1 }
 0x3e0   : > { %v3883_v54 = vmax.f32 %v3875_v7, %v3882_v55  ;;  %v4975_v45 = vpop.f32.mrb[93].mxu1  ;;  %v3487_v55 = vpop.permute.xlu0 %3486 }
 0x3e1   : > { %v4976_v3 = vadd.f32 %v4975_v45, %v4974_v9  ;;  %v4977_v22 = vpop.f32.mrb[94].mxu1 }
 0x3e2   : > { %v4978_v39 = vpop.f32.mrb[95].mxu1 }
 0x3e3   : > { %v6968_v25 = vadd.f32 %v4976_v3, %v3457_v53  ;;  %v4979_v57 = vadd.f32 %v4978_v39, %v4977_v22 }
 0x3e5   : > { %v3884_v14 = vsel %vm3855_vm1, %v6968_v25, -inf  ;;  %v6972_v1 = vadd.f32 %v4979_v57, %v3462_v8 }
 0x3e6   : > { %v3885_v28 = vmax.f32 %v3877_v62, %v3884_v14 }
 0x3e7   : > { %v3886_v24 = vsel %vm3855_vm1, %v6972_v1, -inf  ;;  %v4980_v6 = vpop.f32.mrb[96].mxu1 }
 0x3e8   : > { %v3887_v33 = vmax.f32 %v3879_v13, %v3886_v24  ;;  %v4981_v63 = vpop.f32.mrb[97].mxu1  ;;  %v3482_v13 = vpop.permute.xlu1 %3481 }
 0x3e9   : > { %v4982_v31 = vadd.f32 %v4981_v63, %v4980_v6  ;;  %v4983_v60 = vpop.f32.mrb[98].mxu1 }
 0x3ea   : > { %v4984_v40 = vpop.f32.mrb[99].mxu1 }
 0x3eb   : > { %v6976_v52 = vadd.f32 %v4982_v31, %v3467_v26  ;;  %v4985_v0 = vadd.f32 %v4984_v40, %v4983_v60 }
 0x3ec   : > { %v3492_v3 = vpop.permute.xlu1 %3491 }
 0x3ed   : > { %v3888_v58 = vsel %vm3855_vm1, %v6976_v52, -inf  ;;  %v6980_v7 = vadd.f32 %v4985_v0, %v3472_v20 }
 0x3ee   : > { %v3889_v23 = vmax.f32 %v3881_v29, %v3888_v58 }
 0x3ef   : > { %v3890_v41 = vsel %vm3855_vm1, %v6980_v7, -inf  ;;  %v4986_v36 = vpop.f32.mrb[100].mxu1 }
 0x3f0   : > { %v3891_v59 = vmax.f32 %v3883_v54, %v3890_v41  ;;  %v4987_v49 = vpop.f32.mrb[101].mxu1  ;;  %v3502_v26 = vpop.permute.xlu1 %3501 }
 0x3f1   : > { %v4988_v44 = vadd.f32 %v4987_v49, %v4986_v36  ;;  %v4989_v30 = vpop.f32.mrb[102].mxu1 }
 0x3f2   : > { %v4990_v62 = vpop.f32.mrb[103].mxu1 }
 0x3f3   : > { %v6984_v11 = vadd.f32 %v4988_v44, %v3477_v42  ;;  %v4991_v2 = vadd.f32 %v4990_v62, %v4989_v30 }
 0x3f5   : > { %v3892_v46 = vsel %vm3855_vm1, %v6984_v11, -inf  ;;  %v6988_v21 = vadd.f32 %v4991_v2, %v3482_v13  ;;  %v3512_v2 = vpop.permute.xlu1 %3511 }
 0x3f6   : > { %v3893_v35 = vmax.f32 %v3885_v28, %v3892_v46 }
 0x3f7   : > { %v3894_v50 = vsel %vm3855_vm1, %v6988_v21, -inf  ;;  %v4992_v17 = vpop.f32.mrb[104].mxu1 }
 0x3f8   : > { %v3895_v48 = vmax.f32 %v3887_v33, %v3894_v50  ;;  %v4993_v51 = vpop.f32.mrb[105].mxu1  ;;  %v3497_v33 = vpop.permute.xlu0 %3496 }
 0x3f9   : > { %v4994_v34 = vadd.f32 %v4993_v51, %v4992_v17  ;;  %v4995_v29 = vpop.f32.mrb[106].mxu1 }
 0x3fa   : > { %v4996_v9 = vpop.f32.mrb[107].mxu1 }
 0x3fb   : > { %v6992_v54 = vadd.f32 %v4994_v34, %v3487_v55  ;;  %v4997_v45 = vadd.f32 %v4996_v9, %v4995_v29 }
 0x3fc   : > { %v3507_v44 = vpop.permute.xlu0 %3506 }
 0x3fd   : > { %v3896_v22 = vsel %vm3855_vm1, %v6992_v54, -inf  ;;  %v6996_v53 = vadd.f32 %v4997_v45, %v3492_v3 }
 0x3fe   : > { %v3897_v39 = vmax.f32 %v3889_v23, %v3896_v22  ;;  %v3522_v22 = vpop.permute.xlu1 %3521 }
 0x3ff   : > { %v3898_v57 = vsel %vm3855_vm1, %v6996_v53, -inf  ;;  %v4998_v8 = vpop.f32.mrb[108].mxu1 }
 0x400   : > { %v3899_v14 = vmax.f32 %v3891_v59, %v3898_v57  ;;  %v4999_v28 = vpop.f32.mrb[109].mxu1  ;;  %v3517_v55 = vpop.permute.xlu0 %3516 }
 0x401   : > { %v5000_v24 = vadd.f32 %v4999_v28, %v4998_v8  ;;  %v5001_v6 = vpop.f32.mrb[110].mxu1 }
 0x402   : > { %v5002_v63 = vpop.f32.mrb[111].mxu1 }
 0x403   : > { %v7000_v31 = vadd.f32 %v5000_v24, %v3497_v33  ;;  %v5003_v60 = vadd.f32 %v5002_v63, %v5001_v6 }
 0x405   : > { %v3900_v40 = vsel %vm3855_vm1, %v7000_v31, -inf  ;;  %v7004_v0 = vadd.f32 %v5003_v60, %v3502_v26 }
 0x406   : > { %v3901_v20 = vmax.f32 %v3893_v35, %v3900_v40 }
 0x407   : > { %v3902_v58 = vsel %vm3855_vm1, %v7004_v0, -inf  ;;  %v5004_v23 = vpop.f32.mrb[112].mxu1 }
 0x408   : > { %v3903_v41 = vmax.f32 %v3895_v48, %v3902_v58  ;;  %v5005_v36 = vpop.f32.mrb[113].mxu1 }
 0x409   : > { %v5006_v59 = vadd.f32 %v5005_v36, %v5004_v23  ;;  %v5007_v49 = vpop.f32.mrb[114].mxu1  ;;  %v3532_v36 = vpop.permute.xlu1 %3531 }
 0x40a   : > { %v5008_v30 = vpop.f32.mrb[115].mxu1 }
 0x40b   : > { %v7008_v42 = vadd.f32 %v5006_v59, %v3507_v44  ;;  %v5009_v62 = vadd.f32 %v5008_v30, %v5007_v49 }
 0x40d   : > { %v3904_v13 = vsel %vm3855_vm1, %v7008_v42, -inf  ;;  %v7012_v46 = vadd.f32 %v5009_v62, %v3512_v2 }
 0x40e   : > { %v3905_v35 = vmax.f32 %v3897_v39, %v3904_v13 }
 0x40f   : > { %v3906_v50 = vsel %vm3855_vm1, %v7012_v46, -inf  ;;  %v5010_v17 = vpop.f32.mrb[116].mxu1 }
 0x410   : > { %v3907_v48 = vmax.f32 %v3899_v14, %v3906_v50  ;;  %v5011_v51 = vpop.f32.mrb[117].mxu1  ;;  %v3527_v14 = vpop.permute.xlu0 %3526 }
 0x411   : > { %v5012_v34 = vadd.f32 %v5011_v51, %v5010_v17  ;;  %v5013_v29 = vpop.f32.mrb[118].mxu1 }
 0x412   : > { %v5014_v9 = vpop.f32.mrb[119].mxu1 }
 0x413   : > { %v3841_v45 = vadd.f32 %v5012_v34, %v3517_v55  ;;  %v5015_v3 = vadd.f32 %v5014_v9, %v5013_v29 }
 0x415   : > { %v3908_v57 = vsel %vm3855_vm1, %v3841_v45, -inf  ;;  %v3844_v8 = vadd.f32 %v5015_v3, %v3522_v22 }
 0x416   : > { %v3909_v28 = vmax.f32 %v3901_v20, %v3908_v57 }
 0x417   : > { %v3910_v24 = vsel %vm3855_vm1, %v3844_v8, -inf  ;;  %v5016_v39 = vpop.f32.mrb[120].mxu1 }
 0x418   : > { %v3911_v6 = vmax.f32 %v3903_v41, %v3910_v24  ;;  %v5017_v33 = vpop.f32.mrb[121].mxu1 }
 0x419   : > { %v5018_v63 = vadd.f32 %v5017_v33, %v5016_v39  ;;  %v5019_v60 = vpop.f32.mrb[122].mxu1 }
 0x41a   : > { %v3916_v26 = vmax.f32 %v3909_v28, %v3911_v6  ;;  %v5020_v40 = vpop.f32.mrb[123].mxu1 }
 0x41b   : > { %v3849_v58 = vadd.f32 %v5018_v63, %v3527_v14  ;;  %v5021_v23 = vadd.f32 %v5020_v40, %v5019_v60 }
 0x41d   : > { %v3912_v59 = vsel %vm3855_vm1, %v3849_v58, -inf  ;;  %v3852_v49 = vadd.f32 %v5021_v23, %v3532_v36 }
 0x41e   : > { %v3913_v44 = vmax.f32 %v3905_v35, %v3912_v59 }
 0x41f   : > { %v3914_v30 = vsel %vm3855_vm1, %v3852_v49, -inf }
 0x420   : > { %v3915_v20 = vmax.f32 %v3907_v48, %v3914_v30 }
 0x422   : > { %v3917_v62 = vmax.f32 %v3913_v44, %v3915_v20 }
 0x424   : > { %v3918_v2 = vmax.f32 %v3916_v26, %v3917_v62 }
 0x426   : > { %v3919_v13 = vrot.slane %v3918_v2, 4 }
 0x428   : > { %v3920_v41 = vmax.f32 %v3918_v2, %v3919_v13 }
 0x42a   : > { %v3921_v50 = vrot.slane %v3920_v41, 2 }
 0x42c   : > { %v3922_v17 = vmax.f32 %v3920_v41, %v3921_v50 }
 0x42e   : > { %v3923_v51 = vrot.slane %v3922_v17, 1 }
 0x430   : > { %v3924_v34 = vmax.f32 %v3922_v17, %v3923_v51 }
 0x432   : > { %v7021_v29 = vsub.f32 %v6904_v16, %v3924_v34  ;;  %v7024_v55 = vsub.f32 %v6906_v47, %v3924_v34  ;;  %v7027_v9 = vsub.f32 %v6920_v38, %v3924_v34  ;;  %v7030_v35 = vsub.f32 %v6922_v10, %v3924_v34 }
 0x433   : > { %v7033_v48 = vsub.f32 %v6908_v43, %v3924_v34  ;;  %v7036_v3 = vsub.f32 %v6914_v61, %v3924_v34  ;;  %v7039_v22 = vsub.f32 %v6924_v5, %v3924_v34  ;;  %v7042_v16 = vsub.f32 %v6930_v18, %v3924_v34 }
 0x434   : > { %v7045_v47 = vsub.f32 %v6936_v37, %v3924_v34  ;;  %v7048_v38 = vsub.f32 %v6940_v27, %v3924_v34  ;;  %v7051_v10 = vsub.f32 %v6944_v32, %v3924_v34  ;;  %v7054_v43 = vsub.f32 %v6948_v56, %v3924_v34 }
 0x435   : > { %v7057_v61 = vsub.f32 %v6952_v19, %v3924_v34  ;;  %v7060_v5 = vsub.f32 %v6956_v12, %v3924_v34  ;;  %v7063_v18 = vsub.f32 %v6960_v4, %v3924_v34  ;;  %v7066_v37 = vsub.f32 %v6964_v15, %v3924_v34 }
 0x436   : > { %v7069_v27 = vsub.f32 %v6968_v25, %v3924_v34  ;;  %v7072_v32 = vsub.f32 %v6972_v1, %v3924_v34  ;;  %v7075_v56 = vsub.f32 %v6976_v52, %v3924_v34  ;;  %v7078_v19 = vsub.f32 %v6980_v7, %v3924_v34 }
 0x437   : > { %v7081_v12 = vsub.f32 %v6984_v11, %v3924_v34  ;;  %v7084_v4 = vsub.f32 %v6988_v21, %v3924_v34  ;;  %v7087_v15 = vsub.f32 %v6992_v54, %v3924_v34  ;;  %v7090_v25 = vsub.f32 %v6996_v53, %v3924_v34 }
 0x438   : > { %v7093_v1 = vsub.f32 %v7000_v31, %v3924_v34  ;;  %v7096_v52 = vsub.f32 %v7004_v0, %v3924_v34  ;;  %v7099_v7 = vsub.f32 %v7008_v42, %v3924_v34  ;;  %v7102_v11 = vsub.f32 %v7012_v46, %v3924_v34 }
 0x439   : > { %v7104_v21 = vsub.f32 %v3841_v45, %v3924_v34  ;;  %v7106_v57 = vsub.f32 %v3844_v8, %v3924_v34  ;;  %v7108_v54 = vsub.f32 %v3849_v58, %v3924_v34  ;;  %v7110_v53 = vsub.f32 %v3852_v49, %v3924_v34 }
 0x43a   : > { %v3957_v31 = vmul.f32 1.442695, %v7021_v29  ;;  %v3959_v28 = vmul.f32 1.442695, %v7024_v55  ;;  %v3961_v0 = vmul.f32 1.442695, %v7027_v9 }
 0x43b   : > { %v3963_v42 = vmul.f32 1.442695, %v7030_v35  ;;  %v3965_v46 = vmul.f32 1.442695, %v7033_v48  ;;  %v3967_v45 = vmul.f32 1.442695, %v7036_v3 }
 0x43c   : > { %5308 = vpow2.f32 %v3957_v31  ;;  %v3969_v8 = vmul.f32 1.442695, %v7039_v22  ;;  %v3971_v24 = vmul.f32 1.442695, %v7042_v16  ;;  %v3973_v39 = vmul.f32 1.442695, %v7045_v47 }
 0x43d   : > { %5310 = vpow2.f32 %v3959_v28  ;;  %v3975_v63 = vmul.f32 1.442695, %v7048_v38  ;;  %v3977_v58 = vmul.f32 1.442695, %v7051_v10  ;;  %v3979_v49 = vmul.f32 1.442695, %v7054_v43 }
 0x43e   : > { %5312 = vpow2.f32 %v3961_v0  ;;  %v3981_v62 = vmul.f32 1.442695, %v7057_v61  ;;  %v3983_v50 = vmul.f32 1.442695, %v7060_v5  ;;  %v3985_v31 = vmul.f32 1.442695, %v7063_v18 }
 0x43f   : > { %5314 = vpow2.f32 %v3963_v42 }
 0x440   : > { %5316 = vpow2.f32 %v3965_v46  ;;  %v3987_v46 = vmul.f32 1.442695, %v7066_v37 }
 0x441   : > { %5318 = vpow2.f32 %v3967_v45 }
 0x442   : > { %5320 = vpow2.f32 %v3969_v8 }
 0x443   : > { %5322 = vpow2.f32 %v3971_v24 }
 0x444   : > { %5324 = vpow2.f32 %v3973_v39  ;;  %v3989_v39 = vmul.f32 1.442695, %v7069_v27 }
 0x445   : > { %5326 = vpow2.f32 %v3975_v63 }
 0x446   : > { %v5309_v6 = vpop.eup %5308  ;;  %5328 = vpow2.f32 %v3977_v58  ;;  %v3993_v58 = vmul.f32 1.442695, %v7075_v56 }
 0x447   : > { %v5311_v33 = vpop.eup %5310  ;;  %v4021_v60 = vsel %vm3855_vm1, %v5309_v6, 0.0  ;;  %5330 = vpow2.f32 %v3979_v49  ;;  %v3995_v49 = vmul.f32 1.442695, %v7078_v19 }
 0x448   : > { %v5313_v14 = vpop.eup %5312  ;;  %v4022_v26 = vsel %vm3855_vm1, %v5311_v33, 0.0  ;;  %5332 = vpow2.f32 %v3981_v62  ;;  %v3997_v62 = vmul.f32 1.442695, %v7081_v12 }
 0x449   : > { %v5315_v40 = vpop.eup %5314  ;;  %v4023_v23 = vadd.f32 %v4022_v26, %v4021_v60  ;;  %v4024_v36 = vsel %vm3855_vm1, %v5313_v14, 0.0  ;;  %5334 = vpow2.f32 %v3983_v50  ;;  %v3991_v60 = vmul.f32 1.442695, %v7072_v32 }
 0x44a   : > { %v5317_v59 = vpop.eup %5316  ;;  %v4026_v30 = vsel %vm3855_vm1, %v5315_v40, 0.0  ;;  %5336 = vpow2.f32 %v3985_v31  ;;  %v3999_v50 = vmul.f32 1.442695, %v7084_v4  ;;  %v4001_v31 = vmul.f32 1.442695, %v7087_v15 }
 0x44b   : > { %v4025_v44 = vadd.f32 %v4024_v36, %v4023_v23  ;;  %v5319_v20 = vpop.eup %5318  ;;  %v4028_v13 = vsel %vm3855_vm1, %v5317_v59, 0.0  ;;  %5338 = vpow2.f32 %v3987_v46  ;;  %v4003_v46 = vmul.f32 1.442695, %v7090_v25 }
 0x44c   : > { %v5321_v41 = vpop.eup %5320  ;;  %v4030_v51 = vsel %vm3855_vm1, %v5319_v20, 0.0  ;;  %5340 = vpow2.f32 %v3989_v39  ;;  %v4005_v39 = vmul.f32 1.442695, %v7093_v1 }
 0x44d   : > { %v4027_v2 = vadd.f32 %v4026_v30, %v4025_v44  ;;  %v5323_v34 = vpop.eup %5322  ;;  %v4032_v0 = vsel %vm3855_vm1, %v5321_v41, 0.0  ;;  %5342 = vpow2.f32 %v3991_v60  ;;  %v4007_v60 = vmul.f32 1.442695, %v7096_v52 }
 0x44e   : > { %v5325_v42 = vpop.eup %5324  ;;  %v4034_v8 = vsel %vm3855_vm1, %v5323_v34, 0.0  ;;  %5344 = vpow2.f32 %v3993_v58  ;;  %v4009_v58 = vmul.f32 1.442695, %v7099_v7 }
 0x44f   : > { %v4029_v17 = vadd.f32 %v4028_v13, %v4027_v2  ;;  %v5327_v24 = vpop.eup %5326  ;;  %v4036_v33 = vsel %vm3855_vm1, %v5325_v42, 0.0  ;;  %5346 = vpow2.f32 %v3995_v49  ;;  %v4011_v49 = vmul.f32 1.442695, %v7102_v11 }
 0x450   : > { %v5329_v63 = vpop.eup %5328  ;;  %v4038_v26 = vsel %vm3855_vm1, %v5327_v24, 0.0  ;;  %5348 = vpow2.f32 %v3997_v62  ;;  %v4013_v62 = vmul.f32 1.442695, %v7104_v21 }
 0x451   : > { %v4031_v28 = vadd.f32 %v4030_v51, %v4029_v17  ;;  %v5331_v40 = vpop.eup %5330  ;;  %v4040_v36 = vsel %vm3855_vm1, %v5329_v63, 0.0  ;;  %5350 = vpow2.f32 %v3999_v50  ;;  %v4015_v50 = vmul.f32 1.442695, %v7106_v57 }
 0x452   : > { %v5333_v59 = vpop.eup %5332  ;;  %v4042_v30 = vsel %vm3855_vm1, %v5331_v40, 0.0  ;;  %5352 = vpow2.f32 %v4001_v31  ;;  %v4017_v31 = vmul.f32 1.442695, %v7108_v54 }
 0x453   : > { %v4033_v45 = vadd.f32 %v4032_v0, %v4031_v28  ;;  %v5335_v20 = vpop.eup %5334  ;;  %v4044_v13 = vsel %vm3855_vm1, %v5333_v59, 0.0  ;;  %5354 = vpow2.f32 %v4003_v46  ;;  %v4019_v46 = vmul.f32 1.442695, %v7110_v53 }
 0x454   : > { %v5337_v41 = vpop.eup %5336  ;;  %v4046_v51 = vsel %vm3855_vm1, %v5335_v20, 0.0  ;;  %5356 = vpow2.f32 %v4005_v39 }
 0x455   : > { %v4035_v6 = vadd.f32 %v4034_v8, %v4033_v45  ;;  %v5339_v34 = vpop.eup %5338  ;;  %v4048_v0 = vsel %vm3855_vm1, %v5337_v41, 0.0  ;;  %5358 = vpow2.f32 %v4007_v60 }
 0x456   : > { %v5341_v42 = vpop.eup %5340  ;;  %v4050_v8 = vsel %vm3855_vm1, %v5339_v34, 0.0  ;;  %5360 = vpow2.f32 %v4009_v58 }
 0x457   : > { %v4037_v14 = vadd.f32 %v4036_v33, %v4035_v6  ;;  %v5343_v24 = vpop.eup %5342  ;;  %v4052_v33 = vsel %vm3855_vm1, %v5341_v42, 0.0  ;;  %5362 = vpow2.f32 %v4011_v49 }
 0x458   : > { %v5345_v63 = vpop.eup %5344  ;;  %5364 = vpow2.f32 %v4013_v62 }
 0x459   : > { %v4039_v23 = vadd.f32 %v4038_v26, %v4037_v14  ;;  %v4054_v26 = vsel %vm3855_vm1, %v5343_v24, 0.0  ;;  %v5347_v40 = vpop.eup %5346  ;;  %5366 = vpow2.f32 %v4015_v50 }
 0x45a   : > { %v5349_v59 = vpop.eup %5348  ;;  %5368 = vpow2.f32 %v4017_v31 }
 0x45b   : > { %v4041_v44 = vadd.f32 %v4040_v36, %v4039_v23  ;;  %v4056_v36 = vsel %vm3855_vm1, %v5345_v63, 0.0  ;;  %v5351_v20 = vpop.eup %5350  ;;  %5370 = vpow2.f32 %v4019_v46 }
 0x45c   : > { %v5353_v41 = vpop.eup %5352 }
 0x45d   : > { %v4043_v2 = vadd.f32 %v4042_v30, %v4041_v44  ;;  %v4058_v30 = vsel %vm3855_vm1, %v5347_v40, 0.0  ;;  %v5355_v34 = vpop.eup %5354 }
 0x45e   : > { %v5357_v42 = vpop.eup %5356 }
 0x45f   : > { %v4045_v17 = vadd.f32 %v4044_v13, %v4043_v2  ;;  %v4060_v13 = vsel %vm3855_vm1, %v5349_v59, 0.0  ;;  %v5359_v24 = vpop.eup %5358 }
 0x460   : > { %v4070_v60 = vsel %vm3855_vm1, %v5359_v24, 0.0 }
 0x461   : > { %v4047_v28 = vadd.f32 %v4046_v51, %v4045_v17  ;;  %v4062_v51 = vsel %vm3855_vm1, %v5351_v20, 0.0 }
 0x463   : > { %v4049_v45 = vadd.f32 %v4048_v0, %v4047_v28  ;;  %v4064_v0 = vsel %vm3855_vm1, %v5353_v41, 0.0 }
 0x465   : > { %v4051_v6 = vadd.f32 %v4050_v8, %v4049_v45  ;;  %v4066_v8 = vsel %vm3855_vm1, %v5355_v34, 0.0 }
 0x467   : > { %v4053_v14 = vadd.f32 %v4052_v33, %v4051_v6  ;;  %v4068_v6 = vsel %vm3855_vm1, %v5357_v42, 0.0  ;;  %v5361_v33 = vpop.eup %5360 }
 0x468   : > { %v4072_v40 = vsel %vm3855_vm1, %v5361_v33, 0.0 }
 0x469   : > { %v4055_v23 = vadd.f32 %v4054_v26, %v4053_v14  ;;  %v5363_v14 = vpop.eup %5362 }
 0x46a   : > { %v5365_v58 = vpop.eup %5364 }
 0x46b   : > { %v4057_v44 = vadd.f32 %v4056_v36, %v4055_v23  ;;  %v4074_v36 = vsel %vm3855_vm1, %v5363_v14, 0.0  ;;  %v5367_v59 = vpop.eup %5366 }
 0x46c   : > { %v4078_v62 = vsel %vm3855_vm1, %v5367_v59, 0.0 }
 0x46d   : > { %v4059_v2 = vadd.f32 %v4058_v30, %v4057_v44  ;;  %v4076_v44 = vsel %vm3855_vm1, %v5365_v58, 0.0  ;;  %v5369_v30 = vpop.eup %5368 }
 0x46e   : > { %v4080_v41 = vsel %vm3855_vm1, %v5369_v30, 0.0 }
 0x46f   : > { %v4061_v17 = vadd.f32 %v4060_v13, %v4059_v2  ;;  %v5371_v2 = vpop.eup %5370 }
 0x471   : > { %v4063_v28 = vadd.f32 %v4062_v51, %v4061_v17  ;;  %v4082_v17 = vsel %vm3855_vm1, %v5371_v2, 0.0 }
 0x473   : > { %v4065_v45 = vadd.f32 %v4064_v0, %v4063_v28 }
 0x475   : > { %v4067_v39 = vadd.f32 %v4066_v8, %v4065_v45 }
 0x477   : > { %v4069_v63 = vadd.f32 %v4068_v6, %v4067_v39 }
 0x479   : > { %v4071_v26 = vadd.f32 %v4070_v60, %v4069_v63 }
 0x47b   : > { %v4073_v23 = vadd.f32 %v4072_v40, %v4071_v26 }
 0x47d   : > { %v4075_v49 = vadd.f32 %v4074_v36, %v4073_v23 }
 0x47f   : > { %v4077_v20 = vadd.f32 %v4076_v44, %v4075_v49 }
 0x481   : > { %v4079_v13 = vadd.f32 %v4078_v62, %v4077_v20 }
 0x483   : > { %v4081_v50 = vadd.f32 %v4080_v41, %v4079_v13 }
 0x485   : > { %v4083_v51 = vadd.f32 %v4082_v17, %v4081_v50 }
 0x487   : > { %v4084_v34 = vrot.slane %v4083_v51, 4 }
 0x489   : > { %v4085_v31 = vadd.f32 %v4084_v34, %v4083_v51 }
 0x48b   : > { %v4086_v28 = vrot.slane %v4085_v31, 2 }
 0x48d   : > { %v4087_v0 = vadd.f32 %v4086_v28, %v4085_v31 }
 0x48f   : > { %v4088_v42 = vrot.slane %v4087_v0, 1 }
 0x491   : > { %v4089_v46 = vadd.f32 %v4088_v42, %v4087_v0 }
 0x493   : > { %5372 = vlog2.f32 %v4089_v46 }
 0x49d   : > { %v5373_v45 = vpop.eup %5372 }
 0x49e   : > { %v4091_v8 = vmul.f32 0.6931472, %v5373_v45 }
 0x4a0   : > { %v4092_v24 = vsub.f32 %v7021_v29, %v4091_v8  ;;  %v4093_v39 = vsub.f32 %v7024_v55, %v4091_v8  ;;  %v4094_v6 = vsub.f32 %v7027_v9, %v4091_v8  ;;  %v4095_v33 = vsub.f32 %v7030_v35, %v4091_v8 }
 0x4a1   : > { %v4096_v63 = vsub.f32 %v7033_v48, %v4091_v8  ;;  %v4097_v60 = vsub.f32 %v7036_v3, %v4091_v8  ;;  %v4098_v14 = vsub.f32 %v7039_v22, %v4091_v8  ;;  %v4099_v26 = vsub.f32 %v7042_v16, %v4091_v8 }
 0x4a2   : > { %v4100_v40 = vsub.f32 %v7045_v47, %v4091_v8  ;;  %v4101_v58 = vsub.f32 %v7048_v38, %v4091_v8  ;;  %v4102_v29 = vsub.f32 %v7051_v10, %v4091_v8  ;;  %v4103_v55 = vsub.f32 %v7054_v43, %v4091_v8 }
 0x4a3   : > { %v4104_v9 = vsub.f32 %v7057_v61, %v4091_v8  ;;  %v4105_v35 = vsub.f32 %v7060_v5, %v4091_v8  ;;  %v4106_v48 = vsub.f32 %v7063_v18, %v4091_v8  ;;  %v4107_v3 = vsub.f32 %v7066_v37, %v4091_v8 }
 0x4a4   : > { %v4108_v22 = vsub.f32 %v7069_v27, %v4091_v8  ;;  %v4109_v16 = vsub.f32 %v7072_v32, %v4091_v8  ;;  %v4110_v47 = vsub.f32 %v7075_v56, %v4091_v8  ;;  %v4111_v38 = vsub.f32 %v7078_v19, %v4091_v8 }
 0x4a5   : > { %v7198_v10 = vsub.f32 %v7081_v12, %v4091_v8  ;;  %v7201_v43 = vsub.f32 %v7084_v4, %v4091_v8  ;;  %v7204_v61 = vsub.f32 %v7087_v15, %v4091_v8  ;;  %v7207_v5 = vsub.f32 %v7090_v25, %v4091_v8 }
 0x4a6   : > { %v7210_v18 = vsub.f32 %v7093_v1, %v4091_v8  ;;  %v7213_v37 = vsub.f32 %v7096_v52, %v4091_v8  ;;  %v7216_v27 = vsub.f32 %v7099_v7, %v4091_v8  ;;  %v7219_v32 = vsub.f32 %v7102_v11, %v4091_v8 }
 0x4a7   : > { %v7227_v56 = vsub.f32 %v7104_v21, %v4091_v8  ;;  %v7230_v19 = vsub.f32 %v7106_v57, %v4091_v8  ;;  %v7233_v12 = vsub.f32 %v7108_v54, %v4091_v8  ;;  %v7236_v4 = vsub.f32 %v7110_v53, %v4091_v8 }
 0x4a8   : > { %v4621_v15 = vpack.c.bf16 %v4092_v24, %v4092_v24  ;;  %v4622_v25 = vpack.c.bf16 %v4093_v39, %v4093_v39  ;;  %v4623_v1 = vpack.c.bf16 %v4094_v6, %v4094_v6  ;;  %v4624_v52 = vpack.c.bf16 %v4095_v33, %v4095_v33 }
 0x4a9   : > { %v4625_v7 = vpack.c.bf16 %v4096_v63, %v4096_v63  ;;  %v4626_v11 = vpack.c.bf16 %v4097_v60, %v4097_v60  ;;  %v4627_v21 = vpack.c.bf16 %v4098_v14, %v4098_v14  ;;  %v4628_v57 = vpack.c.bf16 %v4099_v26, %v4099_v26 }
 0x4aa   : > { %v4629_v23 = vpack.c.bf16 %v4100_v40, %v4100_v40  ;;  %v4630_v54 = vpack.c.bf16 %v4101_v58, %v4101_v58  ;;  %v4631_v36 = vpack.c.bf16 %v4102_v29, %v4102_v29  ;;  %v4632_v59 = vpack.c.bf16 %v4103_v55, %v4103_v55  ;;  %4253 = vst.msk [vmem:[%s7224_s10] sm:$0xf] %vm4252_vm2, %v4621_v15 }
 0x4ab   : > { %4254 = vst.msk [vmem:[%s7224_s10 + $0x4] sm:$0xf] %vm4252_vm2, %v4622_v25  ;;  %4255 = vst.msk [vmem:[%s7224_s10 + $0x8] sm:$0xf] %vm4252_vm2, %v4623_v1  ;;  %v4633_v53 = vpack.c.bf16 %v4104_v9, %v4104_v9  ;;  %v4634_v49 = vpack.c.bf16 %v4105_v35, %v4105_v35  ;;  %v4635_v44 = vpack.c.bf16 %v4106_v48, %v4106_v48 }
 0x4ac   : > { %4256 = vst.msk [vmem:[%s7224_s10 + $0xc] sm:$0xf] %vm4252_vm2, %v4624_v52  ;;  %v4636_v30 = vpack.c.bf16 %v4107_v3, %v4107_v3  ;;  %4257 = vst.msk [vmem:[%s7224_s10 + $0x10] sm:$0xf] %vm4252_vm2, %v4625_v7  ;;  %v4637_v20 = vpack.c.bf16 %v4108_v22, %v4108_v22  ;;  %v4638_v62 = vpack.c.bf16 %v4109_v16, %v4109_v16 }
 0x4ad   : > { %4258 = vst.msk [vmem:[%s7224_s10 + $0x14] sm:$0xf] %vm4252_vm2, %v4626_v11  ;;  %4259 = vst.msk [vmem:[%s7224_s10 + $0x18] sm:$0xf] %vm4252_vm2, %v4627_v21  ;;  %v4639_v2 = vpack.c.bf16 %v4110_v47, %v4110_v47  ;;  %v4640_v13 = vpack.c.bf16 %v4111_v38, %v4111_v38  ;;  %v4641_v41 = vpack.c.bf16 %v7198_v10, %v7198_v10 }
 0x4ae   : > { %4260 = vst.msk [vmem:[%s7224_s10 + $0x1c] sm:$0xf] %vm4252_vm2, %v4628_v57  ;;  %4261 = vst.msk [vmem:[%s7224_s10 + $0x20] sm:$0xf] %vm4252_vm2, %v4629_v23  ;;  %v4642_v50 = vpack.c.bf16 %v7201_v43, %v7201_v43  ;;  %v4643_v17 = vpack.c.bf16 %v7204_v61, %v7204_v61  ;;  %v4644_v51 = vpack.c.bf16 %v7207_v5, %v7207_v5 }
 0x4af   : > { %4262 = vst.msk [vmem:[%s7224_s10 + $0x24] sm:$0xf] %vm4252_vm2, %v4630_v54  ;;  %4263 = vst.msk [vmem:[%s7224_s10 + $0x28] sm:$0xf] %vm4252_vm2, %v4631_v36  ;;  %v4645_v34 = vpack.c.bf16 %v7210_v18, %v7210_v18  ;;  %v4646_v31 = vpack.c.bf16 %v7213_v37, %v7213_v37  ;;  %v4647_v28 = vpack.c.bf16 %v7216_v27, %v7216_v27 }
 0x4b0   : > { %4264 = vst.msk [vmem:[%s7224_s10 + $0x2c] sm:$0xf] %vm4252_vm2, %v4632_v59  ;;  %4265 = vst.msk [vmem:[%s7224_s10 + $0x30] sm:$0xf] %vm4252_vm2, %v4633_v53  ;;  %v4648_v0 = vpack.c.bf16 %v7219_v32, %v7219_v32  ;;  %v4649_v42 = vpack.c.bf16 %v7227_v56, %v7227_v56  ;;  %v4650_v46 = vpack.c.bf16 %v7230_v19, %v7230_v19 }
 0x4b1   : > { %4266 = vst.msk [vmem:[%s7224_s10 + $0x34] sm:$0xf] %vm4252_vm2, %v4634_v49  ;;  %4267 = vst.msk [vmem:[%s7224_s10 + $0x38] sm:$0xf] %vm4252_vm2, %v4635_v44  ;;  %v4651_v45 = vpack.c.bf16 %v7233_v12, %v7233_v12  ;;  %v4652_v8 = vpack.c.bf16 %v7236_v4, %v7236_v4 }
 0x4b2   : > { %4268 = vst.msk [vmem:[%s7224_s10 + $0x3c] sm:$0xf] %vm4252_vm2, %v4636_v30  ;;  %4269 = vst.msk [vmem:[%s7224_s10 + $0x40] sm:$0xf] %vm4252_vm2, %v4637_v20 }
 0x4b3   : > { %4270 = vst.msk [vmem:[%s7224_s10 + $0x44] sm:$0xf] %vm4252_vm2, %v4638_v62  ;;  %4271 = vst.msk [vmem:[%s7224_s10 + $0x48] sm:$0xf] %vm4252_vm2, %v4639_v2 }
 0x4b4   : > { %4272 = vst.msk [vmem:[%s7224_s10 + $0x4c] sm:$0xf] %vm4252_vm2, %v4640_v13  ;;  %4273 = vst.msk [vmem:[%s7224_s10 + $0x50] sm:$0xf] %vm4252_vm2, %v4641_v41 }
 0x4b5   : > { %4274 = vst.msk [vmem:[%s7224_s10 + $0x54] sm:$0xf] %vm4252_vm2, %v4642_v50  ;;  %4275 = vst.msk [vmem:[%s7224_s10 + $0x58] sm:$0xf] %vm4252_vm2, %v4643_v17 }
 0x4b6   : > { %4276 = vst.msk [vmem:[%s7224_s10 + $0x5c] sm:$0xf] %vm4252_vm2, %v4644_v51  ;;  %4277 = vst.msk [vmem:[%s7224_s10 + $0x60] sm:$0xf] %vm4252_vm2, %v4645_v34 }
 0x4b7   : > { %4278 = vst.msk [vmem:[%s7224_s10 + $0x64] sm:$0xf] %vm4252_vm2, %v4646_v31  ;;  %4279 = vst.msk [vmem:[%s7224_s10 + $0x68] sm:$0xf] %vm4252_vm2, %v4647_v28 }
 0x4b8   : > { %4280 = vst.msk [vmem:[%s7224_s10 + $0x6c] sm:$0xf] %vm4252_vm2, %v4648_v0  ;;  %4281 = vst.msk [vmem:[%s7224_s10 + $0x70] sm:$0xf] %vm4252_vm2, %v4649_v42 }
 0x4b9   : > { %4282 = vst.msk [vmem:[%s7224_s10 + $0x74] sm:$0xf] %vm4252_vm2, %v4650_v46  ;;  %4283 = vst.msk [vmem:[%s7224_s10 + $0x78] sm:$0xf] %vm4252_vm2, %v4651_v45 }
 0x4ba   : > { %4284 = vst.msk [vmem:[%s7224_s10 + $0x7c] sm:$0xf] %vm4252_vm2, %v4652_v8 }
 0x4bb PF: > { %s17_s26 = sadd.s32 1, %s5396_s26   ;;  %s7405_s24 = smov %s5392_s25 }
 0x4bc   : > { %p14_p5 = scmp.ge.s32.totalorder %s17_s26, 4   ;;  %s7406_s25 = smov %s7408_s27 }
 0x4be   :  { %16 = sbr.rel (!%p14_p5) target bundleno = 2 (0x2), region = 78 }

</bundles_post_ra>
